<compile_context>
chip_gen: v5e
topology: v5e:2x2
jax: 0.10.0
libtpu: 0.0.40
codegen_flags: <defaults>
</compile_context>

<pallas_src>
import jax
import jax.numpy as jnp
import numpy as np
from jax.experimental import pallas as pl
from jax.experimental.pallas import tpu as pltpu


def _round_up(x, m):
    return (x + m - 1) // m * m


def _vmem_limit_bytes(pipelined, scratch):
    """Scoped-VMEM budget: (8,128)-padded buffer sizes, x2 for double buffering."""
    def padded_bytes(shape, dtype):
        item = np.dtype(dtype).itemsize
        dims = list(shape)
        dims[-1] = _round_up(dims[-1], 128)
        if len(dims) >= 2:
            dims[-2] = _round_up(dims[-2], max(8, 32 // item))
        n = 1
        for d in dims:
            n *= d
        return n * item

    total = 2 * sum(padded_bytes(s, d) for s, d in pipelined)
    total += sum(padded_bytes(s, d) for s, d in scratch)
    # Generous headroom, clamped to stay within every generation's physical VMEM.
    return int(min(max(4 * total, 32 * 2**20), 64 * 2**20))


def _double_conv_kernel(xcol_ref, w1_ref, b1_ref, w2_ref, b2_ref, o_ref, mid_ref):
    """One (n, band) grid step of the fused double conv.

    xcol_ref: (H+2, W, 9*Cin)    bf16  im2col of the zero-padded input (whole image)
    w1_ref:   (9*Cin, Cmid)      bf16  conv1 weights (BN1 scale folded), flattened
    b1_ref:   (1, Cmid)          f32   folded conv1 + BN1 bias
    w2_ref:   (3, 3, Cmid, Cout) bf16  conv2 weights (BN2 scale folded)
    b2_ref:   (1, Cout)          f32   folded conv2 + BN2 bias
    o_ref:    (TH, W, Cout)      f32   output row band
    mid_ref:  (TH+2, W+2, Cmid)  f32   scratch: conv1 band (+1-row recompute halo,
                                       +1-col zero halo), stays in VMEM
    """
    TH, W, Cout = o_ref.shape
    Cmid = mid_ref.shape[2]
    band = pl.program_id(1)
    n_bands = pl.num_programs(1)
    r0 = pl.multiple_of(band * TH, TH)

    # ---- conv1 + BN1 + ReLU over TH+2 rows (1-row recompute halo on each side) ----
    # Single K = 9*Cin MXU pass: bf16 operands, f32 accumulation.
    patch1 = xcol_ref[pl.ds(r0, TH + 2), :, :]                    # (TH+2, W, 9*Cin)
    acc1 = jax.lax.dot_general(
        patch1, w1_ref[...],
        dimension_numbers=(((2,), (0,)), ((), ())),
        preferred_element_type=jnp.float32)                        # (TH+2, W, Cmid)
    y1 = jnp.maximum(acc1 + b1_ref[0], 0.0)
    mid_ref[:, pl.ds(1, W), :] = y1                                # interior columns

    # ---- zero only the halo strips (O(TH+W) stores, not O(TH*W)) -------------------
    zero_col = jnp.zeros((TH + 2, 1, Cmid), jnp.float32)
    mid_ref[:, pl.ds(0, 1), :] = zero_col
    mid_ref[:, pl.ds(W + 1, 1), :] = zero_col
    zero_row = jnp.zeros((1, W + 2, Cmid), jnp.float32)

    @pl.when(band == 0)                    # conv1 "row -1" is conv2's zero padding
    def _():
        mid_ref[pl.ds(0, 1), :, :] = zero_row

    @pl.when(band == n_bands - 1)          # conv1 "row H" is conv2's zero padding
    def _():
        mid_ref[pl.ds(TH + 1, 1), :, :] = zero_row

    # ---- conv2 + BN2 + ReLU (9-tap accumulate over the VMEM-resident mid) ----------
    acc2 = jnp.zeros((TH, W, Cout), jnp.float32)
    for kh in range(3):
        for kw in range(3):
            patch = mid_ref[pl.ds(kh, TH), pl.ds(kw, W), :].astype(jnp.bfloat16)
            acc2 = acc2 + jax.lax.dot_general(
                patch, w2_ref[kh, kw],
                dimension_numbers=(((2,), (0,)), ((), ())),
                preferred_element_type=jnp.float32)
    o_ref[...] = jnp.maximum(acc2 + b2_ref[0], 0.0).astype(o_ref.dtype)


def _fold_bn(conv_bias, gamma, beta, running_mean, running_var, eps=1e-5):
    scale = gamma / jnp.sqrt(running_var + eps)
    bias = (conv_bias - running_mean) * scale + beta
    return scale, bias


@jax.jit
def inconv_forward(x_nchw, params):
    """Matches inconv.forward: x (N, Cin, H, W) -> (N, Cout, H, W)."""
    N, Cin, H, W = x_nchw.shape
    Cout = params["w1"].shape[-1]
    Cmid = Cout                                   # double_conv uses out_ch twice
    TH = 8 if H % 8 == 0 else H                   # row-band height
    n_bands = H // TH

    # Fold eval-mode BN into per-channel scale/bias; fold scale into the weights
    # (in f32), then cast the MXU operands to bf16.
    s1, b1 = _fold_bn(params["b1"], params["bn1_gamma"], params["bn1_beta"],
                      params["bn1_mean"], params["bn1_var"])
    s2, b2 = _fold_bn(params["b2"], params["bn2_gamma"], params["bn2_beta"],
                      params["bn2_mean"], params["bn2_var"])
    w1 = params["w1"].astype(jnp.float32) * s1[None, None, None, :]
    w2 = params["w2"].astype(jnp.float32) * s2[None, None, None, :]
    w1f = w1.reshape(9 * Cin, Cmid).astype(jnp.bfloat16)   # (kh,kw,cin) flattened
    w2f = w2.astype(jnp.bfloat16)                          # (3,3,Cmid,Cout)
    b1f = b1.astype(jnp.float32).reshape(1, Cmid)
    b2f = b2.astype(jnp.float32).reshape(1, Cout)

    # NCHW -> NHWC, bf16 cast, 2-row / 1-col zero pad, and conv1 im2col.  All of this
    # fuses into one small XLA pass over the Cin-wide input.
    x = jnp.transpose(x_nchw, (0, 2, 3, 1)).astype(jnp.bfloat16)
    xp = jnp.pad(x, ((0, 0), (2, 2), (1, 1), (0, 0)))      # (N, H+4, W+2, Cin)
    xcol = jnp.concatenate(
        [xp[:, kh:kh + H + 2, kw:kw + W, :]
         for kh in range(3) for kw in range(3)],
        axis=-1)                                            # (N, H+2, W, 9*Cin)

    vmem_limit = _vmem_limit_bytes(
        pipelined=[((1, H + 2, W, 9 * Cin), jnp.bfloat16),
                   ((9 * Cin, Cmid), jnp.bfloat16),
                   ((1, Cmid), jnp.float32),
                   ((3, 3, Cmid, Cout), jnp.bfloat16),
                   ((1, Cout), jnp.float32),
                   ((1, TH, W, Cout), jnp.float32)],
        scratch=[((TH + 2, W + 2, Cmid), jnp.float32)])

    out = pl.pallas_call(
        _double_conv_kernel,
        out_shape=jax.ShapeDtypeStruct((N, H, W, Cout), jnp.float32),
        grid_spec=pltpu.PrefetchScalarGridSpec(
            num_scalar_prefetch=0,
            grid=(N, n_bands),
            in_specs=[
                pl.BlockSpec((None, H + 2, W, 9 * Cin), lambda n, b: (n, 0, 0, 0)),
                pl.BlockSpec((9 * Cin, Cmid), lambda n, b: (0, 0)),
                pl.BlockSpec((1, Cmid), lambda n, b: (0, 0)),
                pl.BlockSpec((3, 3, Cmid, Cout), lambda n, b: (0, 0, 0, 0)),
                pl.BlockSpec((1, Cout), lambda n, b: (0, 0)),
            ],
            out_specs=pl.BlockSpec((None, TH, W, Cout), lambda n, b: (n, b, 0, 0)),
            scratch_shapes=[pltpu.VMEM((TH + 2, W + 2, Cmid), jnp.float32)],
        ),
        compiler_params=pltpu.CompilerParams(
            dimension_semantics=("parallel", "parallel"),
            vmem_limit_bytes=vmem_limit),
    )(xcol, w1f, b1f, w2f, b2f)

    return jnp.transpose(out, (0, 3, 1, 2))                 # NHWC -> NCHW


def make_inconv_params(key, in_ch, out_ch):
    """Deterministic synthetic parameters mirroring double_conv's __init__ shapes."""
    ks = jax.random.split(key, 10)
    p = {}
    # Conv2d(in_ch, out_ch, 3) — PyTorch weight (out,in,3,3) stored here as HWIO.
    p["w1"] = jax.random.normal(ks[0], (3, 3, in_ch, out_ch), jnp.float32) * 0.1
    p["b1"] = jax.random.normal(ks[1], (out_ch,), jnp.float32) * 0.05
    p["bn1_gamma"] = 1.0 + 0.1 * jax.random.normal(ks[2], (out_ch,), jnp.float32)
    p["bn1_beta"] = 0.1 * jax.random.normal(ks[3], (out_ch,), jnp.float32)
    p["bn1_mean"] = 0.05 * jax.random.normal(ks[4], (out_ch,), jnp.float32)
    p["bn1_var"] = 1.0 + 0.1 * jax.random.uniform(ks[5], (out_ch,), jnp.float32)
    # Conv2d(out_ch, out_ch, 3)
    p["w2"] = jax.random.normal(ks[6], (3, 3, out_ch, out_ch), jnp.float32) * 0.1
    p["b2"] = jax.random.normal(ks[7], (out_ch,), jnp.float32) * 0.05
    p["bn2_gamma"] = 1.0 + 0.1 * jax.random.normal(ks[8], (out_ch,), jnp.float32)
    p["bn2_beta"] = 0.1 * jax.random.normal(ks[9], (out_ch,), jnp.float32)
    p["bn2_mean"] = jnp.zeros((out_ch,), jnp.float32)
    p["bn2_var"] = jnp.ones((out_ch,), jnp.float32)
    return p


def _reference_forward(x_nchw, params):
    """Pure-JAX f32 reference (lax conv) for a correctness check."""
    def conv_bn_relu(x, w_hwio, conv_b, g, be, m, v):
        y = jax.lax.conv_general_dilated(
            x, w_hwio, window_strides=(1, 1), padding=((1, 1), (1, 1)),
            dimension_numbers=("NCHW", "HWIO", "NCHW"))
        s, b = _fold_bn(conv_b, g, be, m, v)
        y = y * s[None, :, None, None] + b[None, :, None, None]
        return jnp.maximum(y, 0.0)

    y = conv_bn_relu(x_nchw, params["w1"], params["b1"], params["bn1_gamma"],
                     params["bn1_beta"], params["bn1_mean"], params["bn1_var"])
    y = conv_bn_relu(y, params["w2"], params["b2"], params["bn2_gamma"],
                     params["bn2_beta"], params["bn2_mean"], params["bn2_var"])
    return y


if __name__ == "__main__":
    N, Cin, Cout, H, W = 2, 4, 8, 16, 16
    key = jax.random.PRNGKey(0)
    kx, kp = jax.random.split(key)
    x = jax.random.normal(kx, (N, Cin, H, W), jnp.float32)
    params = make_inconv_params(kp, Cin, Cout)

    out = inconv_forward(x, params)
    out = jax.block_until_ready(out)

    ref = _reference_forward(x, params)
    assert out.shape == (N, Cout, H, W)
    max_err = float(jnp.max(jnp.abs(out - ref)))
    # bf16 MXU operands (f32 accumulation) -> tolerance relaxed vs the old pure-f32.
    assert jnp.allclose(out, ref, atol=5e-2, rtol=5e-2), (
        f"mismatch vs reference (max abs err {max_err})")

    print("KERNEL_OK")
</pallas_src>

<mosaic_0001>
module attributes {stable_mosaic.version = 11 : i64} {
  func.func @_double_conv_kernel(%arg0: i32, %arg1: i32, %arg2: memref<1x18x16x36xbf16, #tpu.memory_space<vmem>>, %arg3: memref<36x8xbf16, #tpu.memory_space<vmem>>, %arg4: memref<1x8xf32, #tpu.memory_space<vmem>>, %arg5: memref<3x3x8x8xbf16, #tpu.memory_space<vmem>>, %arg6: memref<1x8xf32, #tpu.memory_space<vmem>>, %arg7: memref<1x8x16x8xf32, #tpu.memory_space<vmem>>, %arg8: memref<10x18x8xf32, #tpu.memory_space<vmem>>) attributes {dimension_semantics = [#tpu.dimension_semantics<parallel>, #tpu.dimension_semantics<parallel>], iteration_bounds = array<i64: 2, 2>, scalar_prefetch = 0 : i64, scratch_operands = 1 : i64, tpu.core_type = #tpu.core_type<tc>, window_params = [{transform_indices = @transform_0, window_bounds = array<i64: 1, 18, 16, 36>}, {pipeline_mode = #tpu.pipeline_mode<synchronous>, transform_indices = @transform_1, window_bounds = array<i64: 36, 8>}, {pipeline_mode = #tpu.pipeline_mode<synchronous>, transform_indices = @transform_2, window_bounds = array<i64: 1, 8>}, {pipeline_mode = #tpu.pipeline_mode<synchronous>, transform_indices = @transform_3, window_bounds = array<i64: 3, 3, 8, 8>}, {pipeline_mode = #tpu.pipeline_mode<synchronous>, transform_indices = @transform_4, window_bounds = array<i64: 1, 8>}, {transform_indices = @transform_5, window_bounds = array<i64: 1, 8, 16, 8>}]} {
    %c8_i32 = arith.constant 8 : i32
    %0 = arith.muli %arg1, %c8_i32 : i32
    %1 = tpu.assume_multiple %0, 8 : i32
    %c0 = arith.constant 0 : index
    %2 = arith.index_cast %1 : i32 to index
    %c0_0 = arith.constant 0 : index
    %c0_1 = arith.constant 0 : index
    %3 = vector.load %arg2[%c0, %2, %c0_0, %c0_1] : memref<1x18x16x36xbf16, #tpu.memory_space<vmem>>, vector<1x10x16x36xbf16>
    %4 = vector.shape_cast %3 : vector<1x10x16x36xbf16> to vector<10x16x36xbf16>
    %c0_2 = arith.constant 0 : index
    %c0_3 = arith.constant 0 : index
    %5 = vector.load %arg3[%c0_2, %c0_3] : memref<36x8xbf16, #tpu.memory_space<vmem>>, vector<36x8xbf16>
    %cst = arith.constant dense<0.000000e+00> : vector<10x16x8xf32>
    %6 = tpu.matmul %4, %5, %cst {dimension_numbers = #tpu.dot_dimension_numbers<[2], [0], [0, 1], [1], [0, 0, 0, 1, 1, 1], [], []>} : vector<10x16x36xbf16>, vector<36x8xbf16>, vector<10x16x8xf32> -> vector<10x16x8xf32>
    %c0_4 = arith.constant 0 : index
    %c0_5 = arith.constant 0 : index
    %7 = vector.load %arg4[%c0_4, %c0_5] : memref<1x8xf32, #tpu.memory_space<vmem>>, vector<1x8xf32>
    %8 = vector.shape_cast %7 : vector<1x8xf32> to vector<8xf32>
    %9 = vector.shape_cast %8 : vector<8xf32> to vector<1x1x8xf32>
    %10 = vector.broadcast %9 : vector<1x1x8xf32> to vector<10x16x8xf32>
    %11 = arith.addf %6, %10 : vector<10x16x8xf32>
    %cst_6 = arith.constant 0.000000e+00 : f32
    %12 = vector.broadcast %cst_6 : f32 to vector<10x16x8xf32>
    %13 = arith.maximumf %11, %12 : vector<10x16x8xf32>
    %c0_7 = arith.constant 0 : index
    %c1 = arith.constant 1 : index
    %c0_8 = arith.constant 0 : index
    %14 = vector.load %arg8[%c0_7, %c1, %c0_8] : memref<10x18x8xf32, #tpu.memory_space<vmem>>, vector<10x16x8xf32>
    tpu.vector_store %arg8[%c0_7, %c1, %c0_8], %13 {strides = array<i32>} : memref<10x18x8xf32, #tpu.memory_space<vmem>>, vector<10x16x8xf32>,
    %cst_9 = arith.constant 0.000000e+00 : f32
    %15 = vector.broadcast %cst_9 : f32 to vector<10x1x8xf32>
    %c0_10 = arith.constant 0 : index
    %c0_11 = arith.constant 0 : index
    %c0_12 = arith.constant 0 : index
    %16 = vector.load %arg8[%c0_10, %c0_11, %c0_12] : memref<10x18x8xf32, #tpu.memory_space<vmem>>, vector<10x1x8xf32>
    tpu.vector_store %arg8[%c0_10, %c0_11, %c0_12], %15 {strides = array<i32>} : memref<10x18x8xf32, #tpu.memory_space<vmem>>, vector<10x1x8xf32>,
    %c0_13 = arith.constant 0 : index
    %c17 = arith.constant 17 : index
    %c0_14 = arith.constant 0 : index
    %17 = vector.load %arg8[%c0_13, %c17, %c0_14] : memref<10x18x8xf32, #tpu.memory_space<vmem>>, vector<10x1x8xf32>
    tpu.vector_store %arg8[%c0_13, %c17, %c0_14], %15 {strides = array<i32>} : memref<10x18x8xf32, #tpu.memory_space<vmem>>, vector<10x1x8xf32>,
    %cst_15 = arith.constant 0.000000e+00 : f32
    %18 = vector.broadcast %cst_15 : f32 to vector<1x18x8xf32>
    %c0_i32 = arith.constant 0 : i32
    %19 = arith.cmpi eq, %arg1, %c0_i32 : i32
    %20 = arith.extui %19 : i1 to i32
    %c0_i32_16 = arith.constant 0 : i32
    %21 = arith.cmpi ne, %20, %c0_i32_16 : i32
    scf.if %21 {
      %c0_97 = arith.constant 0 : index
      %c0_98 = arith.constant 0 : index
      %c0_99 = arith.constant 0 : index
      %90 = vector.load %arg8[%c0_97, %c0_98, %c0_99] : memref<10x18x8xf32, #tpu.memory_space<vmem>>, vector<1x18x8xf32>
      tpu.vector_store %arg8[%c0_97, %c0_98, %c0_99], %18 {strides = array<i32>} : memref<10x18x8xf32, #tpu.memory_space<vmem>>, vector<1x18x8xf32>,
    } else {
    }
    %c1_i32 = arith.constant 1 : i32
    %22 = arith.cmpi eq, %arg1, %c1_i32 : i32
    %23 = arith.extui %22 : i1 to i32
    %c0_i32_17 = arith.constant 0 : i32
    %24 = arith.cmpi ne, %23, %c0_i32_17 : i32
    scf.if %24 {
      %c9 = arith.constant 9 : index
      %c0_97 = arith.constant 0 : index
      %c0_98 = arith.constant 0 : index
      %90 = vector.load %arg8[%c9, %c0_97, %c0_98] : memref<10x18x8xf32, #tpu.memory_space<vmem>>, vector<1x18x8xf32>
      tpu.vector_store %arg8[%c9, %c0_97, %c0_98], %18 {strides = array<i32>} : memref<10x18x8xf32, #tpu.memory_space<vmem>>, vector<1x18x8xf32>,
    } else {
    }
    %cst_18 = arith.constant 0.000000e+00 : f32
    %25 = vector.broadcast %cst_18 : f32 to vector<8x16x8xf32>
    %c0_19 = arith.constant 0 : index
    %c0_20 = arith.constant 0 : index
    %c0_21 = arith.constant 0 : index
    %26 = vector.load %arg8[%c0_19, %c0_20, %c0_21] : memref<10x18x8xf32, #tpu.memory_space<vmem>>, vector<8x16x8xf32>
    %27 = arith.truncf %26 : vector<8x16x8xf32> to vector<8x16x8xbf16>
    %c0_22 = arith.constant 0 : index
    %c0_23 = arith.constant 0 : index
    %c0_24 = arith.constant 0 : index
    %c0_25 = arith.constant 0 : index
    %28 = vector.load %arg5[%c0_22, %c0_23, %c0_24, %c0_25] : memref<3x3x8x8xbf16, #tpu.memory_space<vmem>>, vector<1x1x8x8xbf16>
    %29 = vector.shape_cast %28 : vector<1x1x8x8xbf16> to vector<8x8xbf16>
    %cst_26 = arith.constant dense<0.000000e+00> : vector<8x16x8xf32>
    %30 = tpu.matmul %27, %29, %cst_26 {dimension_numbers = #tpu.dot_dimension_numbers<[2], [0], [0, 1], [1], [0, 0, 0, 1, 1, 1], [], []>} : vector<8x16x8xbf16>, vector<8x8xbf16>, vector<8x16x8xf32> -> vector<8x16x8xf32>
    %31 = arith.addf %25, %30 : vector<8x16x8xf32>
    %c0_27 = arith.constant 0 : index
    %c1_28 = arith.constant 1 : index
    %c0_29 = arith.constant 0 : index
    %32 = vector.load %arg8[%c0_27, %c1_28, %c0_29] : memref<10x18x8xf32, #tpu.memory_space<vmem>>, vector<8x16x8xf32>
    %33 = arith.truncf %32 : vector<8x16x8xf32> to vector<8x16x8xbf16>
    %c0_30 = arith.constant 0 : index
    %c1_31 = arith.constant 1 : index
    %c0_32 = arith.constant 0 : index
    %c0_33 = arith.constant 0 : index
    %34 = vector.load %arg5[%c0_30, %c1_31, %c0_32, %c0_33] : memref<3x3x8x8xbf16, #tpu.memory_space<vmem>>, vector<1x1x8x8xbf16>
    %35 = vector.shape_cast %34 : vector<1x1x8x8xbf16> to vector<8x8xbf16>
    %cst_34 = arith.constant dense<0.000000e+00> : vector<8x16x8xf32>
    %36 = tpu.matmul %33, %35, %cst_34 {dimension_numbers = #tpu.dot_dimension_numbers<[2], [0], [0, 1], [1], [0, 0, 0, 1, 1, 1], [], []>} : vector<8x16x8xbf16>, vector<8x8xbf16>, vector<8x16x8xf32> -> vector<8x16x8xf32>
    %37 = arith.addf %31, %36 : vector<8x16x8xf32>
    %c0_35 = arith.constant 0 : index
    %c2 = arith.constant 2 : index
    %c0_36 = arith.constant 0 : index
    %38 = vector.load %arg8[%c0_35, %c2, %c0_36] : memref<10x18x8xf32, #tpu.memory_space<vmem>>, vector<8x16x8xf32>
    %39 = arith.truncf %38 : vector<8x16x8xf32> to vector<8x16x8xbf16>
    %c0_37 = arith.constant 0 : index
    %c2_38 = arith.constant 2 : index
    %c0_39 = arith.constant 0 : index
    %c0_40 = arith.constant 0 : index
    %40 = vector.load %arg5[%c0_37, %c2_38, %c0_39, %c0_40] : memref<3x3x8x8xbf16, #tpu.memory_space<vmem>>, vector<1x1x8x8xbf16>
    %41 = vector.shape_cast %40 : vector<1x1x8x8xbf16> to vector<8x8xbf16>
    %cst_41 = arith.constant dense<0.000000e+00> : vector<8x16x8xf32>
    %42 = tpu.matmul %39, %41, %cst_41 {dimension_numbers = #tpu.dot_dimension_numbers<[2], [0], [0, 1], [1], [0, 0, 0, 1, 1, 1], [], []>} : vector<8x16x8xbf16>, vector<8x8xbf16>, vector<8x16x8xf32> -> vector<8x16x8xf32>
    %43 = arith.addf %37, %42 : vector<8x16x8xf32>
    %c1_42 = arith.constant 1 : index
    %c0_43 = arith.constant 0 : index
    %c0_44 = arith.constant 0 : index
    %44 = vector.load %arg8[%c1_42, %c0_43, %c0_44] : memref<10x18x8xf32, #tpu.memory_space<vmem>>, vector<8x16x8xf32>
    %45 = arith.truncf %44 : vector<8x16x8xf32> to vector<8x16x8xbf16>
    %c1_45 = arith.constant 1 : index
    %c0_46 = arith.constant 0 : index
    %c0_47 = arith.constant 0 : index
    %c0_48 = arith.constant 0 : index
    %46 = vector.load %arg5[%c1_45, %c0_46, %c0_47, %c0_48] : memref<3x3x8x8xbf16, #tpu.memory_space<vmem>>, vector<1x1x8x8xbf16>
    %47 = vector.shape_cast %46 : vector<1x1x8x8xbf16> to vector<8x8xbf16>
    %cst_49 = arith.constant dense<0.000000e+00> : vector<8x16x8xf32>
    %48 = tpu.matmul %45, %47, %cst_49 {dimension_numbers = #tpu.dot_dimension_numbers<[2], [0], [0, 1], [1], [0, 0, 0, 1, 1, 1], [], []>} : vector<8x16x8xbf16>, vector<8x8xbf16>, vector<8x16x8xf32> -> vector<8x16x8xf32>
    %49 = arith.addf %43, %48 : vector<8x16x8xf32>
    %c1_50 = arith.constant 1 : index
    %c1_51 = arith.constant 1 : index
    %c0_52 = arith.constant 0 : index
    %50 = vector.load %arg8[%c1_50, %c1_51, %c0_52] : memref<10x18x8xf32, #tpu.memory_space<vmem>>, vector<8x16x8xf32>
    %51 = arith.truncf %50 : vector<8x16x8xf32> to vector<8x16x8xbf16>
    %c1_53 = arith.constant 1 : index
    %c1_54 = arith.constant 1 : index
    %c0_55 = arith.constant 0 : index
    %c0_56 = arith.constant 0 : index
    %52 = vector.load %arg5[%c1_53, %c1_54, %c0_55, %c0_56] : memref<3x3x8x8xbf16, #tpu.memory_space<vmem>>, vector<1x1x8x8xbf16>
    %53 = vector.shape_cast %52 : vector<1x1x8x8xbf16> to vector<8x8xbf16>
    %cst_57 = arith.constant dense<0.000000e+00> : vector<8x16x8xf32>
    %54 = tpu.matmul %51, %53, %cst_57 {dimension_numbers = #tpu.dot_dimension_numbers<[2], [0], [0, 1], [1], [0, 0, 0, 1, 1, 1], [], []>} : vector<8x16x8xbf16>, vector<8x8xbf16>, vector<8x16x8xf32> -> vector<8x16x8xf32>
    %55 = arith.addf %49, %54 : vector<8x16x8xf32>
    %c1_58 = arith.constant 1 : index
    %c2_59 = arith.constant 2 : index
    %c0_60 = arith.constant 0 : index
    %56 = vector.load %arg8[%c1_58, %c2_59, %c0_60] : memref<10x18x8xf32, #tpu.memory_space<vmem>>, vector<8x16x8xf32>
    %57 = arith.truncf %56 : vector<8x16x8xf32> to vector<8x16x8xbf16>
    %c1_61 = arith.constant 1 : index
    %c2_62 = arith.constant 2 : index
    %c0_63 = arith.constant 0 : index
    %c0_64 = arith.constant 0 : index
    %58 = vector.load %arg5[%c1_61, %c2_62, %c0_63, %c0_64] : memref<3x3x8x8xbf16, #tpu.memory_space<vmem>>, vector<1x1x8x8xbf16>
    %59 = vector.shape_cast %58 : vector<1x1x8x8xbf16> to vector<8x8xbf16>
    %cst_65 = arith.constant dense<0.000000e+00> : vector<8x16x8xf32>
    %60 = tpu.matmul %57, %59, %cst_65 {dimension_numbers = #tpu.dot_dimension_numbers<[2], [0], [0, 1], [1], [0, 0, 0, 1, 1, 1], [], []>} : vector<8x16x8xbf16>, vector<8x8xbf16>, vector<8x16x8xf32> -> vector<8x16x8xf32>
    %61 = arith.addf %55, %60 : vector<8x16x8xf32>
    %c2_66 = arith.constant 2 : index
    %c0_67 = arith.constant 0 : index
    %c0_68 = arith.constant 0 : index
    %62 = vector.load %arg8[%c2_66, %c0_67, %c0_68] : memref<10x18x8xf32, #tpu.memory_space<vmem>>, vector<8x16x8xf32>
    %63 = arith.truncf %62 : vector<8x16x8xf32> to vector<8x16x8xbf16>
    %c2_69 = arith.constant 2 : index
    %c0_70 = arith.constant 0 : index
    %c0_71 = arith.constant 0 : index
    %c0_72 = arith.constant 0 : index
    %64 = vector.load %arg5[%c2_69, %c0_70, %c0_71, %c0_72] : memref<3x3x8x8xbf16, #tpu.memory_space<vmem>>, vector<1x1x8x8xbf16>
    %65 = vector.shape_cast %64 : vector<1x1x8x8xbf16> to vector<8x8xbf16>
    %cst_73 = arith.constant dense<0.000000e+00> : vector<8x16x8xf32>
    %66 = tpu.matmul %63, %65, %cst_73 {dimension_numbers = #tpu.dot_dimension_numbers<[2], [0], [0, 1], [1], [0, 0, 0, 1, 1, 1], [], []>} : vector<8x16x8xbf16>, vector<8x8xbf16>, vector<8x16x8xf32> -> vector<8x16x8xf32>
    %67 = arith.addf %61, %66 : vector<8x16x8xf32>
    %c2_74 = arith.constant 2 : index
    %c1_75 = arith.constant 1 : index
    %c0_76 = arith.constant 0 : index
    %68 = vector.load %arg8[%c2_74, %c1_75, %c0_76] : memref<10x18x8xf32, #tpu.memory_space<vmem>>, vector<8x16x8xf32>
    %69 = arith.truncf %68 : vector<8x16x8xf32> to vector<8x16x8xbf16>
    %c2_77 = arith.constant 2 : index
    %c1_78 = arith.constant 1 : index
    %c0_79 = arith.constant 0 : index
    %c0_80 = arith.constant 0 : index
    %70 = vector.load %arg5[%c2_77, %c1_78, %c0_79, %c0_80] : memref<3x3x8x8xbf16, #tpu.memory_space<vmem>>, vector<1x1x8x8xbf16>
    %71 = vector.shape_cast %70 : vector<1x1x8x8xbf16> to vector<8x8xbf16>
    %cst_81 = arith.constant dense<0.000000e+00> : vector<8x16x8xf32>
    %72 = tpu.matmul %69, %71, %cst_81 {dimension_numbers = #tpu.dot_dimension_numbers<[2], [0], [0, 1], [1], [0, 0, 0, 1, 1, 1], [], []>} : vector<8x16x8xbf16>, vector<8x8xbf16>, vector<8x16x8xf32> -> vector<8x16x8xf32>
    %73 = arith.addf %67, %72 : vector<8x16x8xf32>
    %c2_82 = arith.constant 2 : index
    %c2_83 = arith.constant 2 : index
    %c0_84 = arith.constant 0 : index
    %74 = vector.load %arg8[%c2_82, %c2_83, %c0_84] : memref<10x18x8xf32, #tpu.memory_space<vmem>>, vector<8x16x8xf32>
    %75 = arith.truncf %74 : vector<8x16x8xf32> to vector<8x16x8xbf16>
    %c2_85 = arith.constant 2 : index
    %c2_86 = arith.constant 2 : index
    %c0_87 = arith.constant 0 : index
    %c0_88 = arith.constant 0 : index
    %76 = vector.load %arg5[%c2_85, %c2_86, %c0_87, %c0_88] : memref<3x3x8x8xbf16, #tpu.memory_space<vmem>>, vector<1x1x8x8xbf16>
    %77 = vector.shape_cast %76 : vector<1x1x8x8xbf16> to vector<8x8xbf16>
    %cst_89 = arith.constant dense<0.000000e+00> : vector<8x16x8xf32>
    %78 = tpu.matmul %75, %77, %cst_89 {dimension_numbers = #tpu.dot_dimension_numbers<[2], [0], [0, 1], [1], [0, 0, 0, 1, 1, 1], [], []>} : vector<8x16x8xbf16>, vector<8x8xbf16>, vector<8x16x8xf32> -> vector<8x16x8xf32>
    %79 = arith.addf %73, %78 : vector<8x16x8xf32>
    %c0_90 = arith.constant 0 : index
    %c0_91 = arith.constant 0 : index
    %80 = vector.load %arg6[%c0_90, %c0_91] : memref<1x8xf32, #tpu.memory_space<vmem>>, vector<1x8xf32>
    %81 = vector.shape_cast %80 : vector<1x8xf32> to vector<8xf32>
    %82 = vector.shape_cast %81 : vector<8xf32> to vector<1x1x8xf32>
    %83 = vector.broadcast %82 : vector<1x1x8xf32> to vector<8x16x8xf32>
    %84 = arith.addf %79, %83 : vector<8x16x8xf32>
    %cst_92 = arith.constant 0.000000e+00 : f32
    %85 = vector.broadcast %cst_92 : f32 to vector<8x16x8xf32>
    %86 = arith.maximumf %84, %85 : vector<8x16x8xf32>
    %c0_93 = arith.constant 0 : index
    %c0_94 = arith.constant 0 : index
    %c0_95 = arith.constant 0 : index
    %c0_96 = arith.constant 0 : index
    %87 = vector.load %arg7[%c0_93, %c0_94, %c0_95, %c0_96] : memref<1x8x16x8xf32, #tpu.memory_space<vmem>>, vector<1x8x16x8xf32>
    %88 = vector.shape_cast %87 : vector<1x8x16x8xf32> to vector<8x16x8xf32>
    %89 = vector.shape_cast %86 : vector<8x16x8xf32> to vector<1x8x16x8xf32>
    tpu.vector_store %arg7[%c0_93, %c0_94, %c0_95, %c0_96], %89 {strides = array<i32>} : memref<1x8x16x8xf32, #tpu.memory_space<vmem>>, vector<1x8x16x8xf32>,
    return
  }
  func.func @transform_0(%arg0: i32, %arg1: i32) -> (i32, i32, i32, i32) {
    %c0_i32 = arith.constant 0 : i32
    %c0_i32_0 = arith.constant 0 : i32
    %c0_i32_1 = arith.constant 0 : i32
    %c0_i32_2 = arith.constant 0 : i32
    return %arg0, %c0_i32, %c0_i32_0, %c0_i32_1 : i32, i32, i32, i32
  }
  func.func @transform_1(%arg0: i32, %arg1: i32) -> (i32, i32) {
    %c0_i32 = arith.constant 0 : i32
    %c0_i32_0 = arith.constant 0 : i32
    %c0_i32_1 = arith.constant 0 : i32
    return %c0_i32, %c0_i32_0 : i32, i32
  }
  func.func @transform_2(%arg0: i32, %arg1: i32) -> (i32, i32) {
    %c0_i32 = arith.constant 0 : i32
    %c0_i32_0 = arith.constant 0 : i32
    %c0_i32_1 = arith.constant 0 : i32
    return %c0_i32, %c0_i32_0 : i32, i32
  }
  func.func @transform_3(%arg0: i32, %arg1: i32) -> (i32, i32, i32, i32) {
    %c0_i32 = arith.constant 0 : i32
    %c0_i32_0 = arith.constant 0 : i32
    %c0_i32_1 = arith.constant 0 : i32
    %c0_i32_2 = arith.constant 0 : i32
    %c0_i32_3 = arith.constant 0 : i32
    return %c0_i32, %c0_i32_0, %c0_i32_1, %c0_i32_2 : i32, i32, i32, i32
  }
  func.func @transform_4(%arg0: i32, %arg1: i32) -> (i32, i32) {
    %c0_i32 = arith.constant 0 : i32
    %c0_i32_0 = arith.constant 0 : i32
    %c0_i32_1 = arith.constant 0 : i32
    return %c0_i32, %c0_i32_0 : i32, i32
  }
  func.func @transform_5(%arg0: i32, %arg1: i32) -> (i32, i32, i32, i32) {
    %c0_i32 = arith.constant 0 : i32
    %c0_i32_0 = arith.constant 0 : i32
    %c0_i32_1 = arith.constant 0 : i32
    return %arg0, %arg1, %c0_i32, %c0_i32_0 : i32, i32, i32, i32
  }
}

</mosaic_0001>

<bundles_post_ra>
// kernel: inconv_forward.1
= control target key start
LH: loop header
LB: loop body
LE: loop exit
PB: predicated region body
PF: predicated region fallthrough
CT: control target
= control target key end

     0   :  { %s2421_s18 = smov 0   ;;  %s2423_s19 = smov 0   ;;  %s2950_s0 = inlined_call_operand.vmem [shape: bf16[2,18,16,36], index: 0, kind: input, shape index: {}]   ;;  %s2951_s1 = inlined_call_operand.vmem [shape: bf16[36,8], index: 1, kind: input, shape index: {}]   ;;  %s2952_s2 = inlined_call_operand.vmem [shape: f32[1,8], index: 2, kind: input, shape index: {}]   ;;  %s2953_s3 = inlined_call_operand.vmem [shape: bf16[3,3,8,8], index: 3, kind: input, shape index: {}]   ;;  %s2954_s4 = inlined_call_operand.vmem [shape: f32[1,8], index: 4, kind: input, shape index: {}]   ;;  %s2955_s5 = inlined_call_operand.vmem [shape: f32[2,16,16,8], index: 5, kind: output, shape index: {}]  }
   0x1   :  { %s2425_s20 = smov 0   ;;  %s2427_s21 = smov 0  }
   0x2   :  { %s2429_s22 = smov 0  }
   0x3 LB: > { %s24_s23 = sadd.s32 1, %s2378_s20  ;;  %s27_s24 = sadd.s32 1, %s2382_s21  ;;  %s2386_s22 = sphi %s2429_s22, %s15_s22   ;;  %s2382_s21 = sphi %s2427_s21, %s2959_s21   ;;  %s2378_s20 = sphi %s2425_s20, %s2958_s20   ;;  %s2374_s19 = sphi %s2423_s19, %s2957_s19   ;;  %s2370_s18 = sphi %s2421_s18, %s2956_s18  }
   0x4   : > { %p25_p0 = scmp.ge.s32.totalorder %s24_s23, 2  ;;  %p2134_p1 = scmp.ge.s32.totalorder %s2386_s22, 1 }
   0x5   : > { %p201_p2 = scmp.lt.s32.totalorder %s2386_s22, 5 }
   0x6   : > { %s2961_s23 = smov (%p25_p0, %s24_s23), 0  ;;  %s2963_s24 = smov (!%p25_p0, %s27_s24), %s2382_s21 }
   0x7   : > { %p202_p3 = pnand %p2134_p1, %p201_p2  ;;  %p29_p4 = scmp.ge.s32.totalorder %s2963_s24, 2 }
   0x8   : > { %p234_p5 = scmp.lt.s32.totalorder (!%p202_p3), %s2374_s19, 1  ;;  %s2136_s27 = sshll.u32 (!%p202_p3), %s2370_s18, 3 }
   0x9   : > { %s2965_s24 = smov (%p29_p4, %s2963_s24), 0  ;;  %205 = sbr.rel (%p202_p3) target bundleno = 811 (0x32b), region = 40 }
   0xa   : > { %p242_p6 = scmp.lt.s32.totalorder (!%p202_p3), %s2136_s27, 15  ;;  %s2286_s7 = sshll.u32 (!%p202_p3), %s2370_s18, 6 }
   0xb   : > { %p2201_p7 = scmp.ne.s32.totalorder (!%p202_p3), %s2370_s18, 0 }
   0xe   : > { %v279_v0 = vld [vmem:[%s2951_s1 + $0x10] sm:$0x3]  ;;  %vm380_vm0 = vcmask 1041408   ;;  %s2967_s19 = smov (!%p234_p5, %s2374_s19), 1  ;;  %s2969_s27 = smov (!%p242_p6, %s2136_s27), 15  ;;  %v2298_v4 = vld [vmem:[%s2951_s1 + $0x8] sm:$0xff] }
   0xf   : > { %v343_v1 = vunpack.c.l.b16 %v279_v0  ;;  %s2302_s28 = smul.u32 144, %s2967_s19  ;;  %s2138_s29 = sshll.u32 %s2967_s19, 5  ;;  %v2297_v5 = vld [vmem:[%s2951_s1] sm:$0xff]  ;;  %vm349_vm1 = vcmask 293888   ;;  %vm463_vm2 = vcmask 64512   ;;  %vm484_vm3 = vcmask 57344  }
  0x10   : > { %s2137_s11 = sshll.u32 %s2969_s27, 1  ;;  %v2493_v14 = vld [vmem:[%s2952_s2] ss:$0 sm:$0xff] }
  0x11   : > { %v346_v2 = vpack.c.b16 %v343_v1, %v343_v1  ;;  %s238_s10 = scalar_lea.vmem %s2950_s0, %s2302_s28  ;;  %s246_s12 = sadd.s32 %s2138_s29, %s2137_s11  ;;  %v2388_v1 = vmov 0.0  }
  0x12   : > { %s2139_s13 = sshll.u32 %s246_s12, 3  ;;  %s2472_s25 = scalar_lea.vmem %s238_s10, %s2286_s7  ;;  %485 = vst.msk [vmem:[#allocation2] sm:$0x1] %vm484_vm3, %v2388_v1 }
  0x13   : > { %v382_v3 = vsel %vm380_vm0, %v346_v2, 0  ;;  %s2470_s19 = scalar_lea.vmem %s2955_s5, %s2139_s13  ;;  %v2287_v6 = vld [vmem:[%s2472_s25] sm:$0xff]  ;;  %v2288_v7 = vld [vmem:[%s2472_s25 + $0x8] sm:$0xff]  ;;  %v2289_v8 = vld [vmem:[%s2472_s25 + $0x10] sm:$0xff]  ;;  %486 = vst.msk [vmem:[#allocation2 + $0x18] sm:$0x1] %vm484_vm3, %v2388_v1 }
  0x14   : > { %389 = vmatpush.bf16.msra.mxu0 %v382_v3  ;;  %v2290_v9 = vld [vmem:[%s2472_s25 + $0x18] sm:$0xff]  ;;  %v2291_v10 = vld [vmem:[%s2472_s25 + $0x20] sm:$0xff]  ;;  %v2292_v11 = vld [vmem:[%s2472_s25 + $0x28] sm:$0xff]  ;;  %487 = vst.msk [vmem:[#allocation2 + $0x30] sm:$0x1] %vm484_vm3, %v2388_v1 }
  0x15   : > { %v2293_v12 = vld [vmem:[%s2472_s25 + $0x30] sm:$0xff]  ;;  %v2294_v13 = vld [vmem:[%s2472_s25 + $0x38] sm:$0xff]  ;;  %v2295_v15 = vld [vmem:[%s2472_s25 + $0x40] sm:$0xff]  ;;  %488 = vst.msk [vmem:[#allocation2 + $0x48] sm:$0x1] %vm484_vm3, %v2388_v1 }
  0x16   : > { %v2296_v22 = vld [vmem:[%s2472_s25 + $0x48] sm:$0xff]  ;;  %489 = vst.msk [vmem:[#allocation2 + $0x60] sm:$0x1] %vm484_vm3, %v2388_v1 }
  0x17   : > { %490 = vst.msk [vmem:[#allocation2 + $0x78] sm:$0x1] %vm484_vm3, %v2388_v1 }
  0x18   : > { %390 = vmatpush.bf16.msra.mxu0 %v2298_v4  ;;  %491 = vst.msk [vmem:[#allocation2 + $0x90] sm:$0x1] %vm484_vm3, %v2388_v1 }
  0x19   : > { %492 = vst.msk [vmem:[#allocation2 + $0xa8] sm:$0x1] %vm484_vm3, %v2388_v1 }
  0x1a   : > { %493 = vst.msk [vmem:[#allocation2 + $0xc0] sm:$0x1] %vm484_vm3, %v2388_v1 }
  0x1b   : > { %494 = vst.msk [vmem:[#allocation2 + $0xd8] sm:$0x1] %vm484_vm3, %v2388_v1 }
  0x1c   : > { %391 = vmatpush.bf16.msra.mxu0 %v2297_v5  ;;  %495 = vst.msk [vmem:[#allocation2 + $0x11] sm:$0x1] %vm484_vm3, %v2388_v1 }
  0x1d   : > { %496 = vst.msk [vmem:[#allocation2 + $0x29] sm:$0x1] %vm484_vm3, %v2388_v1 }
  0x1e   : > { %497 = vst.msk [vmem:[#allocation2 + $0x41] sm:$0x1] %vm484_vm3, %v2388_v1 }
  0x1f   : > { %2191 = vmatmul.msk.bf16.vlgmr.msra.gmra.mxu0 %vm349_vm1, %v2287_v6  ;;  %498 = vst.msk [vmem:[#allocation2 + $0x59] sm:$0x1] %vm484_vm3, %v2388_v1 }
  0x20   : > { %499 = vst.msk [vmem:[#allocation2 + $0x71] sm:$0x1] %vm484_vm3, %v2388_v1 }
  0x21   : > { %500 = vst.msk [vmem:[#allocation2 + $0x89] sm:$0x1] %vm484_vm3, %v2388_v1 }
  0x22   : > { %501 = vst.msk [vmem:[#allocation2 + $0xa1] sm:$0x1] %vm484_vm3, %v2388_v1 }
  0x23   : > { %502 = vst.msk [vmem:[#allocation2 + $0xb9] sm:$0x1] %vm484_vm3, %v2388_v1 }
  0x24   : > { %503 = vst.msk [vmem:[#allocation2 + $0xd1] sm:$0x1] %vm484_vm3, %v2388_v1 }
  0x25   : > { %504 = vst.msk [vmem:[#allocation2 + $0xe9] sm:$0x1] %vm484_vm3, %v2388_v1 }
  0x2f   : > { %2192 = vmatmul.msk.bf16.gmra.mxu0 %vm349_vm1, %v2288_v7 }
  0x3f   : > { %2193 = vmatmul.msk.bf16.gmra.mxu0 %vm349_vm1, %v2289_v8 }
  0x4f   : > { %2194 = vmatmul.msk.bf16.gmra.mxu0 %vm349_vm1, %v2290_v9 }
  0x5f   : > { %2195 = vmatmul.msk.bf16.gmra.mxu0 %vm349_vm1, %v2291_v10 }
  0x6f   : > { %2196 = vmatmul.msk.bf16.gmra.mxu0 %vm349_vm1, %v2292_v11 }
  0x7f   : > { %2197 = vmatmul.msk.bf16.gmra.mxu0 %vm349_vm1, %v2293_v12 }
  0x8f   : > { %2198 = vmatmul.msk.bf16.gmra.mxu0 %vm349_vm1, %v2294_v13 }
  0x9c   : > { %v393_v16 = vpop.f32.mrf.mxu0 }
  0x9d   : > { %v394_v17 = vadd.f32 %v2493_v14, %v393_v16 }
  0x9f   : > { %v443_v18 = vmax.f32 %v394_v17, 0.0  ;;  %2199 = vmatmul.msk.bf16.gmra.mxu0 %vm349_vm1, %v2295_v15 }
  0xa1   : > { %464 = vst.msk [vmem:[#allocation2 + $0x1] sm:$0xff] %vm463_vm2, %v443_v18 }
  0xa4   : > { %v395_v19 = vpop.f32.mrf.mxu0 }
  0xa5   : > { %v396_v20 = vadd.f32 %v2493_v14, %v395_v19 }
  0xa7   : > { %v444_v21 = vmax.f32 %v396_v20, 0.0 }
  0xa9   : > { %465 = vst.msk [vmem:[#allocation2 + $0x9] sm:$0xff] %vm463_vm2, %v444_v21 }
  0xac   : > { %v398_v23 = vpop.f32.mrf.mxu0 }
  0xad   : > { %v399_v24 = vadd.f32 %v2493_v14, %v398_v23 }
  0xaf   : > { %v445_v25 = vmax.f32 %v399_v24, 0.0  ;;  %2200 = vmatmul.msk.bf16.gmra.mxu0 %vm349_vm1, %v2296_v22 }
  0xb1   : > { %466 = vst.msk [vmem:[#allocation2 + $0x19] sm:$0xff] %vm463_vm2, %v445_v25 }
  0xb4   : > { %v400_v26 = vpop.f32.mrf.mxu0 }
  0xb5   : > { %v401_v27 = vadd.f32 %v2493_v14, %v400_v26 }
  0xb7   : > { %v446_v28 = vmax.f32 %v401_v27, 0.0 }
  0xb9   : > { %467 = vst.msk [vmem:[#allocation2 + $0x21] sm:$0xff] %vm463_vm2, %v446_v28 }
  0xbc   : > { %v403_v29 = vpop.f32.mrf.mxu0 }
  0xbd   : > { %v404_v30 = vadd.f32 %v2493_v14, %v403_v29 }
  0xbf   : > { %v447_v31 = vmax.f32 %v404_v30, 0.0 }
  0xc1   : > { %468 = vst.msk [vmem:[#allocation2 + $0x31] sm:$0xff] %vm463_vm2, %v447_v31 }
  0xc4   : > { %v405_v32 = vpop.f32.mrf.mxu0 }
  0xc5   : > { %v406_v33 = vadd.f32 %v2493_v14, %v405_v32 }
  0xc7   : > { %v448_v34 = vmax.f32 %v406_v33, 0.0 }
  0xc9   : > { %469 = vst.msk [vmem:[#allocation2 + $0x39] sm:$0xff] %vm463_vm2, %v448_v34 }
  0xcc   : > { %v408_v35 = vpop.f32.mrf.mxu0 }
  0xcd   : > { %v409_v36 = vadd.f32 %v2493_v14, %v408_v35 }
  0xcf   : > { %v449_v37 = vmax.f32 %v409_v36, 0.0 }
  0xd1   : > { %470 = vst.msk [vmem:[#allocation2 + $0x49] sm:$0xff] %vm463_vm2, %v449_v37 }
  0xd4   : > { %v410_v38 = vpop.f32.mrf.mxu0 }
  0xd5   : > { %v411_v39 = vadd.f32 %v2493_v14, %v410_v38 }
  0xd7   : > { %v450_v40 = vmax.f32 %v411_v39, 0.0 }
  0xd9   : > { %471 = vst.msk [vmem:[#allocation2 + $0x51] sm:$0xff] %vm463_vm2, %v450_v40 }
  0xdc   : > { %v413_v41 = vpop.f32.mrf.mxu0 }
  0xdd   : > { %v414_v42 = vadd.f32 %v2493_v14, %v413_v41 }
  0xdf   : > { %v451_v43 = vmax.f32 %v414_v42, 0.0 }
  0xe1   : > { %472 = vst.msk [vmem:[#allocation2 + $0x61] sm:$0xff] %vm463_vm2, %v451_v43 }
  0xe4   : > { %v415_v44 = vpop.f32.mrf.mxu0 }
  0xe5   : > { %v416_v45 = vadd.f32 %v2493_v14, %v415_v44 }
  0xe7   : > { %v452_v46 = vmax.f32 %v416_v45, 0.0 }
  0xe9   : > { %473 = vst.msk [vmem:[#allocation2 + $0x69] sm:$0xff] %vm463_vm2, %v452_v46 }
  0xec   : > { %v418_v47 = vpop.f32.mrf.mxu0 }
  0xed   : > { %v419_v48 = vadd.f32 %v2493_v14, %v418_v47 }
  0xef   : > { %v453_v49 = vmax.f32 %v419_v48, 0.0 }
  0xf1   : > { %474 = vst.msk [vmem:[#allocation2 + $0x79] sm:$0xff] %vm463_vm2, %v453_v49 }
  0xf4   : > { %v420_v50 = vpop.f32.mrf.mxu0 }
  0xf5   : > { %v421_v51 = vadd.f32 %v2493_v14, %v420_v50 }
  0xf7   : > { %v454_v52 = vmax.f32 %v421_v51, 0.0 }
  0xf9   : > { %475 = vst.msk [vmem:[#allocation2 + $0x81] sm:$0xff] %vm463_vm2, %v454_v52 }
  0xfc   : > { %v423_v53 = vpop.f32.mrf.mxu0 }
  0xfd   : > { %v424_v54 = vadd.f32 %v2493_v14, %v423_v53 }
  0xff   : > { %v455_v55 = vmax.f32 %v424_v54, 0.0 }
 0x101   : > { %476 = vst.msk [vmem:[#allocation2 + $0x91] sm:$0xff] %vm463_vm2, %v455_v55 }
 0x104   : > { %v425_v56 = vpop.f32.mrf.mxu0 }
 0x105   : > { %v426_v57 = vadd.f32 %v2493_v14, %v425_v56 }
 0x107   : > { %v456_v58 = vmax.f32 %v426_v57, 0.0 }
 0x109   : > { %477 = vst.msk [vmem:[#allocation2 + $0x99] sm:$0xff] %vm463_vm2, %v456_v58 }
 0x10c   : > { %v428_v59 = vpop.f32.mrf.mxu0 }
 0x10d   : > { %v429_v60 = vadd.f32 %v2493_v14, %v428_v59 }
 0x10f   : > { %v457_v61 = vmax.f32 %v429_v60, 0.0 }
 0x111   : > { %478 = vst.msk [vmem:[#allocation2 + $0xa9] sm:$0xff] %vm463_vm2, %v457_v61 }
 0x114   : > { %v430_v62 = vpop.f32.mrf.mxu0 }
 0x115   : > { %v431_v63 = vadd.f32 %v2493_v14, %v430_v62 }
 0x117   : > { %v458_v0 = vmax.f32 %v431_v63, 0.0 }
 0x119   : > { %479 = vst.msk [vmem:[#allocation2 + $0xb1] sm:$0xff] %vm463_vm2, %v458_v0 }
 0x11c   : > { %v433_v2 = vpop.f32.mrf.mxu0 }
 0x11d   : > { %v434_v3 = vadd.f32 %v2493_v14, %v433_v2 }
 0x11f   : > { %v459_v4 = vmax.f32 %v434_v3, 0.0 }
 0x121   : > { %480 = vst.msk [vmem:[#allocation2 + $0xc1] sm:$0xff] %vm463_vm2, %v459_v4 }
 0x124   : > { %v435_v5 = vpop.f32.mrf.mxu0 }
 0x125   : > { %v436_v6 = vadd.f32 %v2493_v14, %v435_v5 }
 0x127   : > { %v460_v7 = vmax.f32 %v436_v6, 0.0 }
 0x129   : > { %481 = vst.msk [vmem:[#allocation2 + $0xc9] sm:$0xff] %vm463_vm2, %v460_v7 }
 0x12c   : > { %v438_v8 = vpop.f32.mrf.mxu0 }
 0x12d   : > { %v439_v9 = vadd.f32 %v2493_v14, %v438_v8 }
 0x12f   : > { %v461_v10 = vmax.f32 %v439_v9, 0.0 }
 0x131   : > { %482 = vst.msk [vmem:[#allocation2 + $0xd9] sm:$0xff] %vm463_vm2, %v461_v10 }
 0x134   : > { %v440_v11 = vpop.f32.mrf.mxu0 }
 0x135   : > { %v441_v12 = vadd.f32 %v2493_v14, %v440_v11  ;;  %508 = sbr.rel (%p2201_p7) target bundleno = 318 (0x13e), region = 44 }
 0x137   : > { %v462_v13 = vmax.f32 %v441_v12, 0.0 }
 0x139   : > { %483 = vst.msk [vmem:[#allocation2 + $0xe1] sm:$0xff] %vm463_vm2, %v462_v13 }
 0x13a   : > { %vm511_vm4 = vcmask 58368   ;;  %v2389_v15 = vmov 0.0  }
 0x13b   : > { %509 = vst.msk [vmem:[#allocation2] sm:$0xff] %vm463_vm2, %v2389_v15 }
 0x13c   : > { %510 = vst.msk [vmem:[#allocation2 + $0x8] sm:$0xff] %vm463_vm2, %v2389_v15 }
 0x13d   : > { %512 = vst.msk [vmem:[#allocation2 + $0x10] sm:$0x3] %vm511_vm4, %v2389_v15 }
 0x13e PF: > { %p2202_p8 = scmp.ne.s32.totalorder %s2370_s18, 1 }
 0x140   : > { %516 = sbr.rel (%p2202_p8) target bundleno = 329 (0x149), region = 48 }
 0x145   : > { %vm520_vm5 = vcmask 58368   ;;  %v2390_v16 = vmov 0.0  }
 0x146   : > { %518 = vst.msk [vmem:[#allocation2 + $0xd8] sm:$0xff] %vm463_vm2, %v2390_v16 }
 0x147   : > { %519 = vst.msk [vmem:[#allocation2 + $0xe0] sm:$0xff] %vm463_vm2, %v2390_v16 }
 0x148   : > { %521 = vst.msk [vmem:[#allocation2 + $0xe8] sm:$0x3] %vm520_vm5, %v2390_v16 }
 0x149 PF: > { %v2203_v14 = vld [vmem:[%s2953_s3 + $0x4] sm:$0xf]  ;;  %vm653_vm6 = vcmask 1043456   ;;  %v554_v17 = vld [vmem:[%s2953_s3] sm:$0xf]  ;;  %v556_v21 = vld [vmem:[#allocation2 + $0x9] sm:$0xff] }
 0x14a   : > { %v555_v18 = vld [vmem:[#allocation2 + $0x1] sm:$0xff]  ;;  %v655_v19 = vsel %vm653_vm6, %v2203_v14, 0  ;;  %v771_v20 = vsel %vm653_vm6, %v554_v17, 0  ;;  %v565_v23 = vld [vmem:[#allocation2 + $0x79] sm:$0xff]  ;;  %v572_v25 = vpack.c.bf16 %v556_v21, %v556_v21  ;;  %v2238_v36 = vld [vmem:[%s2953_s3 + $0x10] sm:$0xf] }
 0x14b   : > { %v571_v22 = vpack.c.bf16 %v555_v18, %v555_v18  ;;  %v566_v24 = vld [vmem:[#allocation2 + $0x81] sm:$0xff]  ;;  %664 = vmatpush.bf16.msra.mxu1 %v655_v19  ;;  %2299 = vmatpush.bf16.msra.mxu3 %v655_v19  ;;  %v581_v26 = vpack.c.bf16 %v565_v23, %v565_v23  ;;  %v524_v28 = vld [vmem:[#allocation2 + $0x18] sm:$0xff]  ;;  %v2229_v37 = vld [vmem:[%s2953_s3 + $0xc] sm:$0xf]  ;;  %v1254_v45 = vsel %vm653_vm6, %v2238_v36, 0 }
 0x14c   : > { %v582_v27 = vpack.c.bf16 %v566_v24, %v566_v24  ;;  %v525_v29 = vld [vmem:[#allocation2 + $0x20] sm:$0xff]  ;;  %2300 = vmatpush.bf16.msra.mxu2 %v771_v20  ;;  %780 = vmatpush.bf16.msrb.mxu0 %v771_v20  ;;  %v540_v32 = vpack.c.bf16 %v524_v28, %v524_v28  ;;  %v523_v34 = vld [vmem:[#allocation2 + $0x8] sm:$0xff]  ;;  %v606_v38 = vunpack.c.l.b16 %v572_v25  ;;  %v1088_v49 = vsel %vm653_vm6, %v2229_v37, 0  ;;  %v567_v54 = vld [vmem:[#allocation2 + $0x91] sm:$0xff] }
 0x14d   : > { %v522_v30 = vld [vmem:[#allocation2] sm:$0xff]  ;;  %v605_v31 = vunpack.c.l.b16 %v571_v22  ;;  %v541_v33 = vpack.c.bf16 %v525_v29, %v525_v29  ;;  %v615_v39 = vunpack.c.l.b16 %v581_v26  ;;  %v539_v41 = vpack.c.bf16 %v523_v34, %v523_v34  ;;  %v526_v56 = vld [vmem:[#allocation2 + $0x30] sm:$0xff]  ;;  %v527_v57 = vld [vmem:[#allocation2 + $0x38] sm:$0xff] }
 0x14e   : > { %v538_v35 = vpack.c.bf16 %v522_v30, %v522_v30  ;;  %v616_v40 = vunpack.c.l.b16 %v582_v27  ;;  %v724_v42 = vunpack.c.l.b16 %v540_v32  ;;  %v557_v52 = vld [vmem:[#allocation2 + $0x19] sm:$0xff]  ;;  %v558_v53 = vld [vmem:[#allocation2 + $0x21] sm:$0xff]  ;;  %v583_v60 = vpack.c.bf16 %v567_v54, %v567_v54  ;;  %v559_v9 = vld [vmem:[#allocation2 + $0x31] sm:$0xff] }
 0x14f   : > { %2301 = vmatpush.bf16.msrb.mxu3 %v771_v20  ;;  %v725_v43 = vunpack.c.l.b16 %v541_v33  ;;  %v621_v46 = vpack.c.b16 %v606_v38, %v605_v31  ;;  %v723_v48 = vunpack.c.l.b16 %v539_v41  ;;  %1097 = vmatpush.bf16.msrb.mxu1 %v1088_v49  ;;  %v568_v55 = vld [vmem:[#allocation2 + $0x99] sm:$0xff]  ;;  %v573_v58 = vpack.c.bf16 %v557_v52, %v557_v52  ;;  %v569_v11 = vld [vmem:[#allocation2 + $0xa9] sm:$0xff]  ;;  %v570_v12 = vld [vmem:[#allocation2 + $0xb1] sm:$0xff] }
 0x150   : > { %v722_v44 = vunpack.c.l.b16 %v538_v35  ;;  %v2580_v47 = vpack.c.b16 %v616_v40, %v615_v39  ;;  %1263 = vmatpush.bf16.msrb.mxu2 %v1254_v45  ;;  %v574_v59 = vpack.c.bf16 %v558_v53, %v558_v53  ;;  %v584_v61 = vpack.c.bf16 %v568_v55, %v568_v55  ;;  %v560_v10 = vld [vmem:[#allocation2 + $0x39] sm:$0xff]  ;;  %v2220_v13 = vld [vmem:[%s2953_s3 + $0x8] sm:$0xf]  ;;  %v529_v16 = vld [vmem:[#allocation2 + $0x50] sm:$0xff] }
 0x151   : > { %v2583_v50 = vpack.c.b16 %v725_v43, %v724_v42  ;;  %2204 = vmatmul.msk.bf16.vlgmr.msra.gmra.mxu1 %vm463_vm2, %v621_v46  ;;  %v542_v62 = vpack.c.bf16 %v526_v56, %v526_v56  ;;  %v543_v63 = vpack.c.bf16 %v527_v57, %v527_v57  ;;  %v607_v0 = vunpack.c.l.b16 %v573_v58  ;;  %v528_v15 = vld [vmem:[#allocation2 + $0x48] sm:$0xff]  ;;  %v562_v33 = vld [vmem:[#allocation2 + $0x51] sm:$0xff]  ;;  %v530_v36 = vld [vmem:[#allocation2 + $0x60] sm:$0xff] }
 0x152   : > { %2209 = vmatmul.msk.bf16.vlgmr.msra.gmra.mxu3 %vm463_vm2, %v2580_v47  ;;  %v738_v51 = vpack.c.b16 %v723_v48, %v722_v44  ;;  %v608_v1 = vunpack.c.l.b16 %v574_v59  ;;  %v617_v2 = vunpack.c.l.b16 %v583_v60  ;;  %v618_v3 = vunpack.c.l.b16 %v584_v61  ;;  %v561_v32 = vld [vmem:[#allocation2 + $0x49] sm:$0xff]  ;;  %v535_v35 = vld [vmem:[#allocation2 + $0x98] sm:$0xff]  ;;  %v563_v55 = vld [vmem:[#allocation2 + $0x61] sm:$0xff] }
 0x153   : > { %2213 = vmatmul.msk.bf16.vlgmr.msra.gmra.mxu2 %vm463_vm2, %v2583_v50  ;;  %v726_v4 = vunpack.c.l.b16 %v542_v62  ;;  %v727_v5 = vunpack.c.l.b16 %v543_v63  ;;  %v921_v14 = vsel %vm653_vm6, %v2220_v13, 0  ;;  %v575_v17 = vpack.c.bf16 %v559_v9, %v559_v9  ;;  %v534_v34 = vld [vmem:[#allocation2 + $0x90] sm:$0xff]  ;;  %v531_v37 = vld [vmem:[#allocation2 + $0x68] sm:$0xff]  ;;  %v2274_v60 = vld [vmem:[%s2953_s3 + $0x20] sm:$0xf] }
 0x154   : > { %2212 = vmatmul.msk.bf16.vlgmr.msrb.gmra.mxu0 %vm463_vm2, %v738_v51  ;;  %v2591_v6 = vpack.c.b16 %v608_v1, %v607_v0  ;;  %v2593_v7 = vpack.c.b16 %v618_v3, %v617_v2  ;;  %930 = vmatpush.bf16.msra.mxu3 %v921_v14  ;;  %v576_v18 = vpack.c.bf16 %v560_v10, %v560_v10  ;;  %v564_v56 = vld [vmem:[#allocation2 + $0x69] sm:$0xff]  ;;  %v2247_v59 = vld [vmem:[%s2953_s3 + $0x14] sm:$0xf]  ;;  %v2265_v61 = vld [vmem:[%s2953_s3 + $0x1c] sm:$0xf]  ;;  %v1919_v1 = vsel %vm653_vm6, %v2274_v60, 0 }
 0x155   : > { %v2595_v8 = vpack.c.b16 %v727_v5, %v726_v4  ;;  %v585_v19 = vpack.c.bf16 %v569_v11, %v569_v11  ;;  %v586_v20 = vpack.c.bf16 %v570_v12, %v570_v12  ;;  %v544_v21 = vpack.c.bf16 %v528_v15, %v528_v15  ;;  %v536_v57 = vld [vmem:[#allocation2 + $0xa8] sm:$0xff]  ;;  %v537_v58 = vld [vmem:[#allocation2 + $0xb0] sm:$0xff]  ;;  %v532_v62 = vld [vmem:[#allocation2 + $0x78] sm:$0xff]  ;;  %1928 = vmatpush.bf16.msra.mxu2 %v1919_v1 }
 0x156   : > { %v545_v22 = vpack.c.bf16 %v529_v16, %v529_v16  ;;  %v609_v23 = vunpack.c.l.b16 %v575_v17  ;;  %v610_v24 = vunpack.c.l.b16 %v576_v18  ;;  %v577_v38 = vpack.c.bf16 %v561_v32, %v561_v32  ;;  %v533_v63 = vld [vmem:[#allocation2 + $0x80] sm:$0xff] }
 0x157   : > { %v619_v25 = vunpack.c.l.b16 %v585_v19  ;;  %v620_v26 = vunpack.c.l.b16 %v586_v20  ;;  %v728_v27 = vunpack.c.l.b16 %v544_v21  ;;  %v578_v39 = vpack.c.bf16 %v562_v33, %v562_v33  ;;  %v822_v21 = vld [vmem:[#allocation2 + $0x2] sm:$0xff] }
 0x158   : > { %v729_v28 = vunpack.c.l.b16 %v545_v22  ;;  %v2607_v29 = vpack.c.b16 %v610_v24, %v609_v23  ;;  %v550_v40 = vpack.c.bf16 %v534_v34, %v534_v34  ;;  %v551_v41 = vpack.c.bf16 %v535_v35, %v535_v35  ;;  %v823_v22 = vld [vmem:[#allocation2 + $0xa] sm:$0xff]  ;;  %v825_v32 = vld [vmem:[#allocation2 + $0x22] sm:$0xff] }
 0x159   : > { %v2609_v30 = vpack.c.b16 %v620_v26, %v619_v25  ;;  %v546_v42 = vpack.c.bf16 %v530_v36, %v530_v36  ;;  %v547_v43 = vpack.c.bf16 %v531_v37, %v531_v37  ;;  %v611_v44 = vunpack.c.l.b16 %v577_v38  ;;  %v827_v38 = vld [vmem:[#allocation2 + $0x3a] sm:$0xff] }
 0x15a   : > { %v2611_v31 = vpack.c.b16 %v729_v28, %v728_v27  ;;  %v612_v45 = vunpack.c.l.b16 %v578_v39  ;;  %v734_v46 = vunpack.c.l.b16 %v550_v40  ;;  %v735_v48 = vunpack.c.l.b16 %v551_v41  ;;  %v824_v28 = vld [vmem:[#allocation2 + $0x1a] sm:$0xff] }
 0x15b   : > { %v730_v49 = vunpack.c.l.b16 %v546_v42  ;;  %v731_v51 = vunpack.c.l.b16 %v547_v43  ;;  %v1420_v0 = vsel %vm653_vm6, %v2247_v59, 0  ;;  %v1753_v2 = vsel %vm653_vm6, %v2265_v61, 0  ;;  %v828_v43 = vld [vmem:[#allocation2 + $0x4a] sm:$0xff] }
 0x15c   : > { %v2619_v52 = vpack.c.b16 %v612_v45, %v611_v44  ;;  %v2621_v53 = vpack.c.b16 %v735_v48, %v734_v46  ;;  %v579_v3 = vpack.c.bf16 %v563_v55, %v563_v55  ;;  %v580_v4 = vpack.c.bf16 %v564_v56, %v564_v56  ;;  %1762 = vmatpush.bf16.msra.mxu1 %v1753_v2  ;;  %v829_v44 = vld [vmem:[#allocation2 + $0x52] sm:$0xff]  ;;  %v830_v56 = vld [vmem:[#allocation2 + $0x62] sm:$0xff] }
 0x15d   : > { %v2623_v54 = vpack.c.b16 %v731_v51, %v730_v49  ;;  %v552_v5 = vpack.c.bf16 %v536_v57, %v536_v57  ;;  %v553_v9 = vpack.c.bf16 %v537_v58, %v537_v58  ;;  %v548_v10 = vpack.c.bf16 %v532_v62, %v532_v62  ;;  %v831_v57 = vld [vmem:[#allocation2 + $0x6a] sm:$0xff] }
 0x15e   : > { %v549_v11 = vpack.c.bf16 %v533_v63, %v533_v63  ;;  %v613_v12 = vunpack.c.l.b16 %v579_v3  ;;  %v614_v13 = vunpack.c.l.b16 %v580_v4  ;;  %v838_v23 = vpack.c.bf16 %v822_v21, %v822_v21 }
 0x15f   : > { %v736_v15 = vunpack.c.l.b16 %v552_v5  ;;  %v737_v16 = vunpack.c.l.b16 %v553_v9  ;;  %v732_v14 = vunpack.c.l.b16 %v548_v10  ;;  %v839_v24 = vpack.c.bf16 %v823_v22, %v823_v22  ;;  %v832_v9 = vld [vmem:[#allocation2 + $0x7a] sm:$0xff]  ;;  %v833_v10 = vld [vmem:[#allocation2 + $0x82] sm:$0xff] }
 0x160   : > { %v733_v17 = vunpack.c.l.b16 %v549_v11  ;;  %v2643_v18 = vpack.c.b16 %v614_v13, %v613_v12  ;;  %v872_v25 = vunpack.c.l.b16 %v838_v23  ;;  %v840_v33 = vpack.c.bf16 %v824_v28, %v824_v28 }
 0x161   : > { %2205 = vmatmul.msk.bf16.gmra.mxu1 %vm463_vm2, %v2591_v6  ;;  %v2645_v19 = vpack.c.b16 %v737_v16, %v736_v15  ;;  %v873_v26 = vunpack.c.l.b16 %v839_v24  ;;  %v841_v34 = vpack.c.bf16 %v825_v32, %v825_v32  ;;  %v843_v39 = vpack.c.bf16 %v827_v38, %v827_v38 }
 0x162   : > { %2210 = vmatmul.msk.bf16.gmra.mxu3 %vm463_vm2, %v2593_v7  ;;  %v2647_v20 = vpack.c.b16 %v733_v17, %v732_v14  ;;  %v874_v35 = vunpack.c.l.b16 %v840_v33  ;;  %v844_v45 = vpack.c.bf16 %v828_v43, %v828_v43  ;;  %v845_v46 = vpack.c.bf16 %v829_v44, %v829_v44 }
 0x163   : > { %2214 = vmatmul.msk.bf16.gmra.mxu2 %vm463_vm2, %v2595_v8  ;;  %v888_v27 = vpack.c.b16 %v873_v26, %v872_v25  ;;  %v875_v36 = vunpack.c.l.b16 %v841_v34  ;;  %v877_v41 = vunpack.c.l.b16 %v843_v39  ;;  %v846_v60 = vpack.c.bf16 %v830_v56, %v830_v56  ;;  %v1170_v56 = vld [vmem:[#allocation2 + $0xc9] sm:$0xff] }
 0x164   : > { %v878_v48 = vunpack.c.l.b16 %v844_v45  ;;  %v879_v49 = vunpack.c.l.b16 %v845_v46  ;;  %v847_v61 = vpack.c.bf16 %v831_v57, %v831_v57  ;;  %v848_v13 = vpack.c.bf16 %v832_v9, %v832_v9  ;;  %v836_v45 = vld [vmem:[#allocation2 + $0xaa] sm:$0xff]  ;;  %v837_v46 = vld [vmem:[#allocation2 + $0xb2] sm:$0xff] }
 0x165   : > { %v2660_v37 = vpack.c.b16 %v875_v36, %v874_v35  ;;  %v880_v63 = vunpack.c.l.b16 %v846_v60  ;;  %v849_v15 = vpack.c.bf16 %v833_v10, %v833_v10  ;;  %v1186_v10 = vpack.c.bf16 %v1170_v56, %v1170_v56 }
 0x166   : > { %v2676_v51 = vpack.c.b16 %v879_v49, %v878_v48  ;;  %v882_v17 = vunpack.c.l.b16 %v848_v13  ;;  %v1003_v48 = vld [vmem:[#allocation2 + $0xc0] sm:$0xff]  ;;  %v1004_v49 = vld [vmem:[#allocation2 + $0xc8] sm:$0xff] }
 0x167   : > { %v883_v21 = vunpack.c.l.b16 %v849_v15 }
 0x169   : > { %v2704_v24 = vpack.c.b16 %v883_v21, %v882_v17  ;;  %v1220_v21 = vunpack.c.l.b16 %v1186_v10 }
 0x171   : > { %2206 = vmatmul.msk.bf16.gmra.mxu1 %vm463_vm2, %v2607_v29 }
 0x172   : > { %2211 = vmatmul.msk.bf16.gmra.mxu3 %vm463_vm2, %v2609_v30 }
 0x173   : > { %2215 = vmatmul.msk.bf16.gmra.mxu2 %vm463_vm2, %v2611_v31 }
 0x181   : > { %2207 = vmatmul.msk.bf16.gmra.mxu1 %vm463_vm2, %v2619_v52 }
 0x182   : > { %2218 = vmatmul.msk.bf16.vlgmr.msrb.gmra.mxu3 %vm463_vm2, %v2621_v53 }
 0x183   : > { %2216 = vmatmul.msk.bf16.gmra.mxu2 %vm463_vm2, %v2623_v54  ;;  %1429 = vmatpush.bf16.msrb.mxu3 %v1420_v0  ;;  %v881_v0 = vunpack.c.l.b16 %v847_v61 }
 0x185   : > { %v2692_v3 = vpack.c.b16 %v881_v0, %v880_v63  ;;  %v853_v63 = vpack.c.bf16 %v837_v46, %v837_v46  ;;  %v1019_v0 = vpack.c.bf16 %v1003_v48, %v1003_v48 }
 0x187   : > { %v1053_v15 = vunpack.c.l.b16 %v1019_v0 }
 0x191   : > { %2208 = vmatmul.msk.bf16.gmra.mxu1 %vm463_vm2, %v2643_v18 }
 0x192   : > { %2219 = vmatmul.msk.bf16.gmra.mxu3 %vm463_vm2, %v2645_v19 }
 0x193   : > { %2217 = vmatmul.msk.bf16.gmra.mxu2 %vm463_vm2, %v2647_v20 }
 0x1a1   : > { %2230 = vmatmul.msk.bf16.vlgmr.msrb.gmra.mxu1 %vm463_vm2, %v2583_v50  ;;  %v826_v50 = vld [vmem:[#allocation2 + $0x32] sm:$0xff] }
 0x1a2   : > { %2221 = vmatmul.msk.bf16.vlgmr.msra.gmra.mxu3 %vm463_vm2, %v888_v27  ;;  %v835_v27 = vld [vmem:[#allocation2 + $0x9a] sm:$0xff] }
 0x1a3   : > { %2239 = vmatmul.msk.bf16.vlgmr.msrb.gmra.mxu2 %vm463_vm2, %v2591_v6  ;;  %v842_v6 = vpack.c.bf16 %v826_v50, %v826_v50  ;;  %v851_v34 = vpack.c.bf16 %v835_v27, %v835_v27  ;;  %v2256_v50 = vld [vmem:[%s2953_s3 + $0x18] sm:$0xf] }
 0x1a4   : > { %v1587_v38 = vsel %vm653_vm6, %v2256_v50, 0 }
 0x1a5   : > { %v876_v40 = vunpack.c.l.b16 %v842_v6  ;;  %v885_v39 = vunpack.c.l.b16 %v851_v34  ;;  %1596 = vmatpush.bf16.msra.mxu0 %v1587_v38 }
 0x1a7   : > { %v2668_v42 = vpack.c.b16 %v877_v41, %v876_v40 }
 0x1a8   : > { %2257 = vmatmul.msk.bf16.vlgmr.msra.gmra.mxu0 %vm463_vm2, %v2595_v8 }
 0x1b1   : > { %2231 = vmatmul.msk.bf16.gmra.mxu1 %vm463_vm2, %v2595_v8  ;;  %v1169_v8 = vld [vmem:[#allocation2 + $0xc1] sm:$0xff] }
 0x1b2   : > { %2222 = vmatmul.msk.bf16.gmra.mxu3 %vm463_vm2, %v2660_v37  ;;  %v1185_v9 = vpack.c.bf16 %v1169_v8, %v1169_v8 }
 0x1b3   : > { %2240 = vmatmul.msk.bf16.gmra.mxu2 %vm463_vm2, %v2607_v29 }
 0x1b4   : > { %v1219_v17 = vunpack.c.l.b16 %v1185_v9 }
 0x1b8   : > { %2258 = vmatmul.msk.bf16.gmra.mxu0 %vm463_vm2, %v2611_v31 }
 0x1c1   : > { %2232 = vmatmul.msk.bf16.gmra.mxu1 %vm463_vm2, %v2611_v31 }
 0x1c2   : > { %2223 = vmatmul.msk.bf16.gmra.mxu3 %vm463_vm2, %v2668_v42 }
 0x1c3   : > { %2241 = vmatmul.msk.bf16.gmra.mxu2 %vm463_vm2, %v2619_v52 }
 0x1c8   : > { %2259 = vmatmul.msk.bf16.gmra.mxu0 %vm463_vm2, %v2623_v54 }
 0x1ce   : > { %v2678_v55 = vpop.f32.mrf.mxu1 }
 0x1d1   : > { %2233 = vmatmul.msk.bf16.gmra.mxu1 %vm463_vm2, %v2623_v54 }
 0x1d2   : > { %2224 = vmatmul.msk.bf16.gmra.mxu3 %vm463_vm2, %v2676_v51 }
 0x1d3   : > { %2242 = vmatmul.msk.bf16.gmra.mxu2 %vm463_vm2, %v2643_v18 }
 0x1d5   : > { %v2686_v58 = vpop.f32.mrf.mxu3 }
 0x1d6   : > { %v787_v59 = vpop.f32.mrf.mxu2  ;;  %v2688_v62 = vpop.f32.mrf.mxu1 }
 0x1d8   : > { %2260 = vmatmul.msk.bf16.gmra.mxu0 %vm463_vm2, %v2647_v20 }
 0x1dd   : > { %v2690_v1 = vpop.f32.mrf.mxu3 }
 0x1de   : > { %v789_v2 = vpop.f32.mrf.mxu2  ;;  %v671_v4 = vpop.f32.mrf.mxu1 }
 0x1df   : > { %v2694_v5 = vadd.f32 %v787_v59, %v671_v4  ;;  %v852_v59 = vpack.c.bf16 %v836_v45, %v836_v45  ;;  %v782_v45 = vpop.f32.mrf.mxu0 }
 0x1e1   : > { %2234 = vmatmul.msk.bf16.gmra.mxu1 %vm463_vm2, %v2647_v20  ;;  %v886_v13 = vunpack.c.l.b16 %v852_v59 }
 0x1e2   : > { %2225 = vmatmul.msk.bf16.gmra.mxu3 %vm463_vm2, %v2692_v3 }
 0x1e3   : > { %2243 = vmatmul.msk.bf16.gmra.mxu2 %vm463_vm2, %v2580_v47  ;;  %v834_v47 = vld [vmem:[#allocation2 + $0x92] sm:$0xff] }
 0x1e4   : > { %v850_v33 = vpack.c.bf16 %v834_v47, %v834_v47 }
 0x1e5   : > { %v696_v11 = vpop.f32.mrf.mxu3 }
 0x1e6   : > { %v792_v12 = vpop.f32.mrf.mxu2  ;;  %v673_v16 = vpop.f32.mrf.mxu1  ;;  %v884_v6 = vunpack.c.l.b16 %v850_v33  ;;  %v2744_v33 = vpack.c.b16 %v1220_v21, %v1219_v17 }
 0x1e7   : > { %v2702_v14 = vadd.f32 %v789_v2, %v673_v16  ;;  %v1020_v2 = vpack.c.bf16 %v1004_v49, %v1004_v49  ;;  %v784_v56 = vpop.f32.mrf.mxu0 }
 0x1e8   : > { %v2722_v41 = vpack.c.b16 %v885_v39, %v884_v6  ;;  %2261 = vmatmul.msk.bf16.gmra.mxu0 %vm463_vm2, %v2621_v53 }
 0x1e9   : > { %v1054_v16 = vunpack.c.l.b16 %v1020_v2 }
 0x1eb   : > { %v2742_v27 = vpack.c.b16 %v1054_v16, %v1053_v15  ;;  %v1661_v16 = vld [vmem:[#allocation2 + $0x81] sm:$0xff] }
 0x1ed   : > { %v698_v22 = vpop.f32.mrf.mxu3 }
 0x1ee   : > { %v794_v23 = vpop.f32.mrf.mxu2  ;;  %v676_v25 = vpop.f32.mrf.mxu1 }
 0x1ef   : > { %v2706_v26 = vadd.f32 %v792_v12, %v676_v25 }
 0x1f1   : > { %2235 = vmatmul.msk.bf16.gmra.mxu1 %vm463_vm2, %v2621_v53 }
 0x1f2   : > { %2226 = vmatmul.msk.bf16.gmra.mxu3 %vm463_vm2, %v2704_v24 }
 0x1f3   : > { %2244 = vmatmul.msk.bf16.gmra.mxu2 %vm463_vm2, %v2593_v7 }
 0x1f5   : > { %v701_v28 = vpop.f32.mrf.mxu3 }
 0x1f6   : > { %v797_v32 = vpop.f32.mrf.mxu2  ;;  %v678_v35 = vpop.f32.mrf.mxu1 }
 0x1f7   : > { %v2714_v36 = vadd.f32 %v794_v23, %v678_v35 }
 0x1f8   : > { %2262 = vmatmul.msk.bf16.gmra.mxu0 %vm463_vm2, %v2645_v19 }
 0x1fd   : > { %v703_v40 = vpop.f32.mrf.mxu3 }
 0x1fe   : > { %v799_v7 = vpop.f32.mrf.mxu2  ;;  %v681_v43 = vpop.f32.mrf.mxu1 }
 0x1ff   : > { %v2724_v44 = vadd.f32 %v797_v32, %v681_v43 }
 0x201   : > { %2236 = vmatmul.msk.bf16.gmra.mxu1 %vm463_vm2, %v2645_v19 }
 0x202   : > { %2227 = vmatmul.msk.bf16.gmra.mxu3 %vm463_vm2, %v2722_v41 }
 0x203   : > { %2245 = vmatmul.msk.bf16.gmra.mxu2 %vm463_vm2, %v2609_v30  ;;  %v887_v30 = vunpack.c.l.b16 %v853_v63 }
 0x205   : > { %v812_v57 = vpop.f32.mrf.mxu3  ;;  %v2740_v47 = vpack.c.b16 %v887_v30, %v886_v13 }
 0x206   : > { %v802_v60 = vpop.f32.mrf.mxu2  ;;  %v2732_v61 = vadd.f32 %v812_v57, %v696_v11  ;;  %v683_v4 = vpop.f32.mrf.mxu1  ;;  %v785_v57 = vadd.f32 %v784_v56, %v2688_v62 }
 0x207   : > { %v2734_v12 = vadd.f32 %v799_v7, %v683_v4 }
 0x208   : > { %2263 = vmatmul.msk.bf16.gmra.mxu0 %vm463_vm2, %v2742_v27 }
 0x20d   : > { %v814_v23 = vpop.f32.mrf.mxu3 }
 0x20e   : > { %v804_v11 = vpop.f32.mrf.mxu2  ;;  %v2738_v25 = vadd.f32 %v814_v23, %v698_v22  ;;  %v686_v32 = vpop.f32.mrf.mxu1  ;;  %v1677_v23 = vpack.c.bf16 %v1661_v16, %v1661_v16 }
 0x20f   : > { %v2746_v34 = vadd.f32 %v802_v60, %v686_v32 }
 0x211   : > { %2237 = vmatmul.msk.bf16.gmra.mxu1 %vm463_vm2, %v2742_v27 }
 0x212   : > { %2228 = vmatmul.msk.bf16.gmra.mxu3 %vm463_vm2, %v2740_v47 }
 0x213   : > { %2246 = vmatmul.msk.bf16.gmra.mxu2 %vm463_vm2, %v2744_v33 }
 0x215   : > { %v817_v31 = vpop.f32.mrf.mxu3 }
 0x216   : > { %v807_v22 = vpop.f32.mrf.mxu2  ;;  %v2754_v35 = vadd.f32 %v817_v31, %v701_v28  ;;  %v688_v38 = vpop.f32.mrf.mxu1 }
 0x217   : > { %v2757_v50 = vadd.f32 %v807_v22, %v2686_v58  ;;  %v2759_v6 = vadd.f32 %v804_v11, %v688_v38  ;;  %v783_v58 = vadd.f32 %v782_v45, %v2678_v55 }
 0x21d   : > { %v819_v39 = vpop.f32.mrf.mxu3 }
 0x21e   : > { %v809_v7 = vpop.f32.mrf.mxu2  ;;  %v2763_v43 = vadd.f32 %v819_v39, %v703_v40  ;;  %v1099_v48 = vpop.f32.mrf.mxu1 }
 0x21f   : > { %v2766_v46 = vadd.f32 %v809_v7, %v2690_v1 }
 0x221   : > { %2266 = vmatmul.msk.bf16.vlgmr.msra.gmra.mxu1 %vm463_vm2, %v2607_v29 }
 0x222   : > { %2248 = vmatmul.msk.bf16.vlgmr.msrb.gmra.mxu3 %vm463_vm2, %v2660_v37 }
 0x223   : > { %2275 = vmatmul.msk.bf16.vlgmr.msra.gmra.mxu2 %vm463_vm2, %v2668_v42 }
 0x225   : > { %v932_v54 = vpop.f32.mrf.mxu3 }
 0x226   : > { %v972_v28 = vadd.f32 %v932_v54, %v783_v58  ;;  %v1265_v40 = vpop.f32.mrf.mxu2  ;;  %v1101_v49 = vpop.f32.mrf.mxu1  ;;  %v1662_v58 = vld [vmem:[#allocation2 + $0x91] sm:$0xff]  ;;  %v1663_v54 = vld [vmem:[#allocation2 + $0x99] sm:$0xff] }
 0x228   : > { %v1139_v8 = vadd.f32 %v1099_v48, %v972_v28 }
 0x22a   : > { %v2775_v1 = vadd.f32 %v1265_v40, %v1139_v8  ;;  %v1678_v40 = vpack.c.bf16 %v1662_v58, %v1662_v58 }
 0x22d   : > { %v934_v59 = vpop.f32.mrf.mxu3 }
 0x22e   : > { %v973_v29 = vadd.f32 %v934_v59, %v785_v57  ;;  %v1267_v37 = vpop.f32.mrf.mxu2  ;;  %v1104_v60 = vpop.f32.mrf.mxu1  ;;  %v1712_v59 = vunpack.c.l.b16 %v1678_v40 }
 0x230   : > { %v1140_v63 = vadd.f32 %v1101_v49, %v973_v29  ;;  %v1679_v49 = vpack.c.bf16 %v1663_v54, %v1663_v54 }
 0x231   : > { %2267 = vmatmul.msk.bf16.gmra.mxu1 %vm463_vm2, %v2619_v52 }
 0x232   : > { %v2780_v0 = vadd.f32 %v1267_v37, %v1140_v63  ;;  %2249 = vmatmul.msk.bf16.gmra.mxu3 %vm463_vm2, %v2668_v42  ;;  %v1713_v29 = vunpack.c.l.b16 %v1679_v49 }
 0x233   : > { %2276 = vmatmul.msk.bf16.gmra.mxu2 %vm463_vm2, %v2676_v51 }
 0x234   : > { %v1724_v63 = vpack.c.b16 %v1713_v29, %v1712_v59 }
 0x235   : > { %v937_v55 = vpop.f32.mrf.mxu3 }
 0x236   : > { %v974_v62 = vadd.f32 %v937_v55, %v2694_v5  ;;  %v1270_v2 = vpop.f32.mrf.mxu2  ;;  %v1106_v20 = vpop.f32.mrf.mxu1  ;;  %v1660_v5 = vld [vmem:[#allocation2 + $0x79] sm:$0xff] }
 0x237   : > { %v1676_v21 = vpack.c.bf16 %v1660_v5, %v1660_v5 }
 0x238   : > { %v1141_v4 = vadd.f32 %v1104_v60, %v974_v62 }
 0x239   : > { %v1710_v22 = vunpack.c.l.b16 %v1676_v21 }
 0x23a   : > { %v2789_v9 = vadd.f32 %v1270_v2, %v1141_v4  ;;  %v1664_v2 = vld [vmem:[#allocation2 + $0xa9] sm:$0xff] }
 0x23d   : > { %v939_v10 = vpop.f32.mrf.mxu3 }
 0x23e   : > { %v975_v42 = vadd.f32 %v939_v10, %v2702_v14  ;;  %v1272_v13 = vpop.f32.mrf.mxu2  ;;  %v1109_v30 = vpop.f32.mrf.mxu1  ;;  %v1680_v10 = vpack.c.bf16 %v1664_v2, %v1664_v2 }
 0x240   : > { %v1142_v52 = vadd.f32 %v1106_v20, %v975_v42  ;;  %v1665_v20 = vld [vmem:[#allocation2 + $0xb1] sm:$0xff]  ;;  %v1714_v5 = vunpack.c.l.b16 %v1680_v10 }
 0x241   : > { %2268 = vmatmul.msk.bf16.gmra.mxu1 %vm463_vm2, %v2643_v18  ;;  %v1681_v42 = vpack.c.bf16 %v1665_v20, %v1665_v20 }
 0x242   : > { %v2794_v15 = vadd.f32 %v1272_v13, %v1142_v52  ;;  %2250 = vmatmul.msk.bf16.gmra.mxu3 %vm463_vm2, %v2676_v51  ;;  %v1711_v51 = vunpack.c.l.b16 %v1677_v23 }
 0x243   : > { %2277 = vmatmul.msk.bf16.gmra.mxu2 %vm463_vm2, %v2692_v3  ;;  %v1715_v16 = vunpack.c.l.b16 %v1681_v42 }
 0x244   : > { %v1723_v7 = vpack.c.b16 %v1711_v51, %v1710_v22 }
 0x245   : > { %v942_v17 = vpop.f32.mrf.mxu3 }
 0x246   : > { %v976_v53 = vadd.f32 %v942_v17, %v2706_v26  ;;  %v1275_v14 = vpop.f32.mrf.mxu2  ;;  %v1111_v11 = vpop.f32.mrf.mxu1  ;;  %v1503_v17 = vld [vmem:[#allocation2 + $0xe0] sm:$0xff] }
 0x247   : > { %v1519_v21 = vpack.c.bf16 %v1503_v17, %v1503_v17 }
 0x248   : > { %v1143_v32 = vadd.f32 %v1109_v30, %v976_v53 }
 0x249   : > { %v1553_v51 = vunpack.c.l.b16 %v1519_v21 }
 0x24a   : > { %v2803_v31 = vadd.f32 %v1275_v14, %v1143_v32  ;;  %v1725_v32 = vpack.c.b16 %v1715_v16, %v1714_v5 }
 0x24d   : > { %v944_v38 = vpop.f32.mrf.mxu3 }
 0x24e   : > { %v977_v18 = vadd.f32 %v944_v38, %v2714_v36  ;;  %v1277_v39 = vpop.f32.mrf.mxu2  ;;  %v1114_v45 = vpop.f32.mrf.mxu1 }
 0x250   : > { %v1144_v48 = vadd.f32 %v1111_v11, %v977_v18 }
 0x251   : > { %2269 = vmatmul.msk.bf16.gmra.mxu1 %vm463_vm2, %v1723_v7  ;;  %v1833_v7 = vld [vmem:[#allocation2 + $0xca] sm:$0xff] }
 0x252   : > { %v2808_v26 = vadd.f32 %v1277_v39, %v1144_v48  ;;  %2251 = vmatmul.msk.bf16.gmra.mxu3 %vm463_vm2, %v2692_v3 }
 0x253   : > { %2278 = vmatmul.msk.bf16.gmra.mxu2 %vm463_vm2, %v2704_v24 }
 0x255   : > { %v947_v28 = vpop.f32.mrf.mxu3 }
 0x256   : > { %v978_v19 = vadd.f32 %v947_v28, %v2724_v44  ;;  %v1280_v36 = vpop.f32.mrf.mxu2  ;;  %v1116_v8 = vpop.f32.mrf.mxu1 }
 0x258   : > { %v1145_v56 = vadd.f32 %v1114_v45, %v978_v19  ;;  %v1849_v19 = vpack.c.bf16 %v1833_v7, %v1833_v7 }
 0x25a   : > { %v2816_v57 = vadd.f32 %v1280_v36, %v1145_v56  ;;  %v1883_v49 = vunpack.c.l.b16 %v1849_v19 }
 0x25d   : > { %v949_v3 = vpop.f32.mrf.mxu3 }
 0x25e   : > { %v979_v37 = vadd.f32 %v949_v3, %v2734_v12  ;;  %v1282_v60 = vpop.f32.mrf.mxu2  ;;  %v1119_v55 = vpop.f32.mrf.mxu1 }
 0x260   : > { %v1146_v62 = vadd.f32 %v1116_v8, %v979_v37 }
 0x261   : > { %2270 = vmatmul.msk.bf16.gmra.mxu1 %vm463_vm2, %v1724_v63  ;;  %v1669_v63 = vld [vmem:[#allocation2 + $0xe1] sm:$0xff] }
 0x262   : > { %v2821_v44 = vadd.f32 %v1282_v60, %v1146_v62  ;;  %2252 = vmatmul.msk.bf16.gmra.mxu3 %vm463_vm2, %v2704_v24  ;;  %v1502_v24 = vld [vmem:[#allocation2 + $0xd8] sm:$0xff]  ;;  %v1835_v62 = vld [vmem:[#allocation2 + $0xe2] sm:$0xff] }
 0x263   : > { %2279 = vmatmul.msk.bf16.gmra.mxu2 %vm463_vm2, %v2722_v41  ;;  %v1518_v14 = vpack.c.bf16 %v1502_v24, %v1502_v24  ;;  %v1851_v42 = vpack.c.bf16 %v1835_v62, %v1835_v62 }
 0x265   : > { %v952_v4 = vpop.f32.mrf.mxu3  ;;  %v1885_v24 = vunpack.c.l.b16 %v1851_v42 }
 0x266   : > { %v980_v27 = vadd.f32 %v952_v4, %v2746_v34  ;;  %v1285_v12 = vpop.f32.mrf.mxu2  ;;  %v1121_v13 = vpop.f32.mrf.mxu1  ;;  %v1552_v34 = vunpack.c.l.b16 %v1518_v14 }
 0x268   : > { %v1147_v30 = vadd.f32 %v1119_v55, %v980_v27  ;;  %v1561_v18 = vpack.c.b16 %v1553_v51, %v1552_v34  ;;  %v1834_v55 = vld [vmem:[#allocation2 + $0xda] sm:$0xff]  ;;  %v1685_v27 = vpack.c.bf16 %v1669_v63, %v1669_v63 }
 0x269   : > { %v1850_v10 = vpack.c.bf16 %v1834_v55, %v1834_v55 }
 0x26a   : > { %v2829_v52 = vadd.f32 %v1285_v12, %v1147_v30  ;;  %2264 = vmatmul.msk.bf16.gmra.mxu0 %vm463_vm2, %v1561_v18  ;;  %v1719_v5 = vunpack.c.l.b16 %v1685_v27 }
 0x26b   : > { %v1884_v16 = vunpack.c.l.b16 %v1850_v10 }
 0x26d   : > { %v954_v53 = vpop.f32.mrf.mxu3 }
 0x26e   : > { %v981_v23 = vadd.f32 %v954_v53, %v2759_v6  ;;  %v1287_v11 = vpop.f32.mrf.mxu2  ;;  %v1124_v22 = vpop.f32.mrf.mxu1  ;;  %v1832_v6 = vld [vmem:[#allocation2 + $0xc2] sm:$0xff] }
 0x26f   : > { %v1848_v28 = vpack.c.bf16 %v1832_v6, %v1832_v6 }
 0x270   : > { %v1148_v38 = vadd.f32 %v1121_v13, %v981_v23  ;;  %v1893_v23 = vpack.c.b16 %v1885_v24, %v1884_v16 }
 0x271   : > { %2271 = vmatmul.msk.bf16.gmra.mxu1 %vm463_vm2, %v1725_v32 }
 0x272   : > { %v2832_v39 = vadd.f32 %v1287_v11, %v1148_v38  ;;  %2253 = vmatmul.msk.bf16.gmra.mxu3 %vm463_vm2, %v2722_v41  ;;  %v1882_v41 = vunpack.c.l.b16 %v1848_v28 }
 0x273   : > { %2280 = vmatmul.msk.bf16.gmra.mxu2 %vm463_vm2, %v2740_v47 }
 0x274   : > { %v1892_v3 = vpack.c.b16 %v1883_v49, %v1882_v41 }
 0x275   : > { %v957_v45 = vpop.f32.mrf.mxu3 }
 0x276   : > { %v982_v48 = vadd.f32 %v957_v45, %v2757_v50  ;;  %v1290_v58 = vpop.f32.mrf.mxu2  ;;  %v1126_v54 = vpop.f32.mrf.mxu1  ;;  %v1668_v50 = vld [vmem:[#allocation2 + $0xd9] sm:$0xff] }
 0x277   : > { %v1684_v4 = vpack.c.bf16 %v1668_v50, %v1668_v50 }
 0x278   : > { %v1149_v36 = vadd.f32 %v1124_v22, %v982_v48 }
 0x27a   : > { %v2841_v40 = vadd.f32 %v1290_v58, %v1149_v36 }
 0x27d   : > { %v959_v8 = vpop.f32.mrf.mxu3 }
 0x27e   : > { %v983_v56 = vadd.f32 %v959_v8, %v2766_v46  ;;  %v1292_v59 = vpop.f32.mrf.mxu2  ;;  %v1129_v29 = vpop.f32.mrf.mxu1 }
 0x280   : > { %v1150_v37 = vadd.f32 %v1126_v54, %v983_v56 }
 0x281   : > { %2272 = vmatmul.msk.bf16.gmra.mxu1 %vm463_vm2, %v2744_v33  ;;  %v1718_v33 = vunpack.c.l.b16 %v1684_v4 }
 0x282   : > { %v2844_v60 = vadd.f32 %v1292_v59, %v1150_v37  ;;  %2254 = vmatmul.msk.bf16.gmra.mxu3 %vm463_vm2, %v2740_v47  ;;  %v1598_v47 = vpop.f32.mrf.mxu0 }
 0x283   : > { %2281 = vmatmul.msk.bf16.gmra.mxu2 %vm463_vm2, %v1892_v3  ;;  %v1727_v21 = vpack.c.b16 %v1719_v5, %v1718_v33 }
 0x285   : > { %v962_v2 = vpop.f32.mrf.mxu3 }
 0x286   : > { %v984_v46 = vadd.f32 %v962_v2, %v2732_v61  ;;  %v1295_v20 = vpop.f32.mrf.mxu2  ;;  %v1131_v12 = vpop.f32.mrf.mxu1 }
 0x288   : > { %v1151_v13 = vadd.f32 %v1129_v29, %v984_v46  ;;  %v2870_v29 = vld [vmem:[%s2954_s4] ss:$0 sm:$0xff] }
 0x28a   : > { %v2852_v30 = vadd.f32 %v1295_v20, %v1151_v13  ;;  %v1600_v22 = vpop.f32.mrf.mxu0 }
 0x28d   : > { %v964_v17 = vpop.f32.mrf.mxu3 }
 0x28e   : > { %v985_v53 = vadd.f32 %v964_v17, %v2738_v25  ;;  %v1297_v14 = vpop.f32.mrf.mxu2  ;;  %v1134_v61 = vpop.f32.mrf.mxu1 }
 0x290   : > { %v1152_v11 = vadd.f32 %v1131_v12, %v985_v53 }
 0x291   : > { %2273 = vmatmul.msk.bf16.gmra.mxu1 %vm463_vm2, %v1727_v21 }
 0x292   : > { %v2855_v32 = vadd.f32 %v1297_v14, %v1152_v11  ;;  %2255 = vmatmul.msk.bf16.gmra.mxu3 %vm463_vm2, %v1892_v3  ;;  %v1603_v45 = vpop.f32.mrf.mxu0 }
 0x293   : > { %2282 = vmatmul.msk.bf16.gmra.mxu2 %vm463_vm2, %v1893_v23 }
 0x295   : > { %v967_v34 = vpop.f32.mrf.mxu3 }
 0x296   : > { %v986_v51 = vadd.f32 %v967_v34, %v2754_v35  ;;  %v1300_v38 = vpop.f32.mrf.mxu2  ;;  %v1136_v18 = vpop.f32.mrf.mxu1 }
 0x298   : > { %v1153_v25 = vadd.f32 %v1134_v61, %v986_v51 }
 0x29a   : > { %v2861_v6 = vadd.f32 %v1300_v38, %v1153_v25  ;;  %v1605_v8 = vpop.f32.mrf.mxu0 }
 0x29d   : > { %v969_v7 = vpop.f32.mrf.mxu3 }
 0x29e   : > { %v987_v48 = vadd.f32 %v969_v7, %v2763_v43  ;;  %v1302_v58 = vpop.f32.mrf.mxu2  ;;  %v1764_v54 = vpop.f32.mrf.mxu1 }
 0x2a0   : > { %v1154_v28 = vadd.f32 %v1136_v18, %v987_v48 }
 0x2a2   : > { %v2864_v19 = vadd.f32 %v1302_v58, %v1154_v28  ;;  %v1608_v2 = vpop.f32.mrf.mxu0 }
 0x2a5   : > { %v1431_v36 = vpop.f32.mrf.mxu3 }
 0x2a6   : > { %v1471_v41 = vadd.f32 %v1431_v36, %v2775_v1  ;;  %v1930_v49 = vpop.f32.mrf.mxu2  ;;  %v1766_v35 = vpop.f32.mrf.mxu1 }
 0x2a8   : > { %v1638_v56 = vadd.f32 %v1598_v47, %v1471_v41 }
 0x2aa   : > { %v1804_v59 = vadd.f32 %v1764_v54, %v1638_v56  ;;  %v1610_v33 = vpop.f32.mrf.mxu0 }
 0x2ac   : > { %v1970_v43 = vadd.f32 %v1930_v49, %v1804_v59 }
 0x2ad   : > { %v1433_v3 = vpop.f32.mrf.mxu3 }
 0x2ae   : > { %v1990_v37 = vadd.f32 %v2870_v29, %v1970_v43  ;;  %v1472_v50 = vadd.f32 %v1433_v3, %v2780_v0  ;;  %v1932_v63 = vpop.f32.mrf.mxu2  ;;  %v1769_v1 = vpop.f32.mrf.mxu1 }
 0x2b0   : > { %v2006_v55 = vmax.f32 %v1990_v37, 0.0  ;;  %v1639_v62 = vadd.f32 %v1600_v22, %v1472_v50 }
 0x2b2   : > { %2022 = vst.msk [vmem:[%s2470_s19] sm:$0xff] %vm463_vm2, %v2006_v55  ;;  %v1805_v46 = vadd.f32 %v1766_v35, %v1639_v62  ;;  %v1613_v22 = vpop.f32.mrf.mxu0 }
 0x2b4   : > { %v1971_v20 = vadd.f32 %v1932_v63, %v1805_v46 }
 0x2b5   : > { %v1436_v4 = vpop.f32.mrf.mxu3 }
 0x2b6   : > { %v1991_v27 = vadd.f32 %v2870_v29, %v1971_v20  ;;  %v1473_v12 = vadd.f32 %v1436_v4, %v2789_v9  ;;  %v1935_v10 = vpop.f32.mrf.mxu2  ;;  %v1771_v42 = vpop.f32.mrf.mxu1 }
 0x2b8   : > { %v2007_v13 = vmax.f32 %v1991_v27, 0.0  ;;  %v1640_v0 = vadd.f32 %v1603_v45, %v1473_v12 }
 0x2ba   : > { %2023 = vst.msk [vmem:[%s2470_s19 + $0x8] sm:$0xff] %vm463_vm2, %v2007_v13  ;;  %v1806_v47 = vadd.f32 %v1769_v1, %v1640_v0  ;;  %v1615_v41 = vpop.f32.mrf.mxu0 }
 0x2bc   : > { %v1972_v5 = vadd.f32 %v1935_v10, %v1806_v47 }
 0x2bd   : > { %v1438_v16 = vpop.f32.mrf.mxu3 }
 0x2be   : > { %v1992_v24 = vadd.f32 %v2870_v29, %v1972_v5  ;;  %v1474_v17 = vadd.f32 %v1438_v16, %v2794_v15  ;;  %v1937_v53 = vpop.f32.mrf.mxu2  ;;  %v1774_v14 = vpop.f32.mrf.mxu1 }
 0x2c0   : > { %v2008_v21 = vmax.f32 %v1992_v24, 0.0  ;;  %v1641_v9 = vadd.f32 %v1605_v8, %v1474_v17 }
 0x2c2   : > { %2024 = vst.msk [vmem:[%s2470_s19 + $0x10] sm:$0xff] %vm463_vm2, %v2008_v21  ;;  %v1807_v61 = vadd.f32 %v1771_v42, %v1641_v9  ;;  %v1618_v63 = vpop.f32.mrf.mxu0 }
 0x2c4   : > { %v1973_v23 = vadd.f32 %v1937_v53, %v1807_v61 }
 0x2c5   : > { %v1441_v11 = vpop.f32.mrf.mxu3 }
 0x2c6   : > { %v1993_v34 = vadd.f32 %v2870_v29, %v1973_v23  ;;  %v1475_v51 = vadd.f32 %v1441_v11, %v2803_v31  ;;  %v1940_v38 = vpop.f32.mrf.mxu2  ;;  %v1776_v18 = vpop.f32.mrf.mxu1 }
 0x2c8   : > { %v2009_v25 = vmax.f32 %v1993_v34, 0.0  ;;  %v1642_v15 = vadd.f32 %v1608_v2, %v1475_v51 }
 0x2ca   : > { %2025 = vst.msk [vmem:[%s2470_s19 + $0x18] sm:$0xff] %vm463_vm2, %v2009_v25  ;;  %v1808_v7 = vadd.f32 %v1774_v14, %v1642_v15  ;;  %v1620_v10 = vpop.f32.mrf.mxu0 }
 0x2cc   : > { %v1974_v45 = vadd.f32 %v1940_v38, %v1808_v7 }
 0x2cd   : > { %v1443_v48 = vpop.f32.mrf.mxu3 }
 0x2ce   : > { %v1994_v58 = vadd.f32 %v2870_v29, %v1974_v45  ;;  %v1476_v54 = vadd.f32 %v1443_v48, %v2808_v26  ;;  %v1942_v28 = vpop.f32.mrf.mxu2  ;;  %v1779_v36 = vpop.f32.mrf.mxu1 }
 0x2d0   : > { %v2010_v49 = vmax.f32 %v1994_v58, 0.0  ;;  %v1643_v31 = vadd.f32 %v1610_v33, %v1476_v54 }
 0x2d2   : > { %2026 = vst.msk [vmem:[%s2470_s19 + $0x20] sm:$0xff] %vm463_vm2, %v2010_v49  ;;  %v1809_v35 = vadd.f32 %v1776_v18, %v1643_v31  ;;  %v1623_v14 = vpop.f32.mrf.mxu0 }
 0x2d4   : > { %v1975_v8 = vadd.f32 %v1942_v28, %v1809_v35 }
 0x2d5   : > { %v1446_v56 = vpop.f32.mrf.mxu3 }
 0x2d6   : > { %v1995_v59 = vadd.f32 %v2870_v29, %v1975_v8  ;;  %v1477_v43 = vadd.f32 %v1446_v56, %v2816_v57  ;;  %v1945_v3 = vpop.f32.mrf.mxu2  ;;  %v1781_v37 = vpop.f32.mrf.mxu1 }
 0x2d8   : > { %v2011_v50 = vmax.f32 %v1995_v59, 0.0  ;;  %v1644_v26 = vadd.f32 %v1613_v22, %v1477_v43 }
 0x2da   : > { %2027 = vst.msk [vmem:[%s2470_s19 + $0x28] sm:$0xff] %vm463_vm2, %v2011_v50  ;;  %v1810_v1 = vadd.f32 %v1779_v36, %v1644_v26  ;;  %v1625_v15 = vpop.f32.mrf.mxu0 }
 0x2dc   : > { %v1976_v55 = vadd.f32 %v1945_v3, %v1810_v1 }
 0x2dd   : > { %v1448_v62 = vpop.f32.mrf.mxu3 }
 0x2de   : > { %v1996_v2 = vadd.f32 %v2870_v29, %v1976_v55  ;;  %v1478_v46 = vadd.f32 %v1448_v62, %v2821_v44  ;;  %v1947_v20 = vpop.f32.mrf.mxu2  ;;  %v1784_v4 = vpop.f32.mrf.mxu1 }
 0x2e0   : > { %v2012_v27 = vmax.f32 %v1996_v2, 0.0  ;;  %v1645_v57 = vadd.f32 %v1615_v41, %v1478_v46 }
 0x2e2   : > { %2028 = vst.msk [vmem:[%s2470_s19 + $0x30] sm:$0xff] %vm463_vm2, %v2012_v27  ;;  %v1811_v12 = vadd.f32 %v1781_v37, %v1645_v57 }
 0x2e4   : > { %v1977_v42 = vadd.f32 %v1947_v20, %v1811_v12 }
 0x2e5   : > { %v1451_v13 = vpop.f32.mrf.mxu3 }
 0x2e6   : > { %v1997_v0 = vadd.f32 %v2870_v29, %v1977_v42  ;;  %v1479_v47 = vadd.f32 %v1451_v13, %v2829_v52  ;;  %v1950_v33 = vpop.f32.mrf.mxu2  ;;  %v1786_v5 = vpop.f32.mrf.mxu1 }
 0x2e8   : > { %v2013_v16 = vmax.f32 %v1997_v0, 0.0  ;;  %v1646_v44 = vadd.f32 %v1618_v63, %v1479_v47 }
 0x2ea   : > { %2029 = vst.msk [vmem:[%s2470_s19 + $0x38] sm:$0xff] %vm463_vm2, %v2013_v16  ;;  %v1812_v24 = vadd.f32 %v1784_v4, %v1646_v44 }
 0x2ec   : > { %v1978_v17 = vadd.f32 %v1950_v33, %v1812_v24 }
 0x2ed   : > { %v1453_v53 = vpop.f32.mrf.mxu3 }
 0x2ee   : > { %v1998_v21 = vadd.f32 %v2870_v29, %v1978_v17  ;;  %v1480_v9 = vadd.f32 %v1453_v53, %v2832_v39  ;;  %v1952_v61 = vpop.f32.mrf.mxu2  ;;  %v1789_v23 = vpop.f32.mrf.mxu1 }
 0x2f0   : > { %v2014_v11 = vmax.f32 %v1998_v21, 0.0  ;;  %v1647_v52 = vadd.f32 %v1620_v10, %v1480_v9 }
 0x2f2   : > { %2030 = vst.msk [vmem:[%s2470_s19 + $0x40] sm:$0xff] %vm463_vm2, %v2014_v11  ;;  %v1813_v22 = vadd.f32 %v1786_v5, %v1647_v52 }
 0x2f4   : > { %v1979_v34 = vadd.f32 %v1952_v61, %v1813_v22 }
 0x2f5   : > { %v1456_v51 = vpop.f32.mrf.mxu3 }
 0x2f6   : > { %v1999_v38 = vadd.f32 %v2870_v29, %v1979_v34  ;;  %v1481_v18 = vadd.f32 %v1456_v51, %v2841_v40  ;;  %v1955_v25 = vpop.f32.mrf.mxu2  ;;  %v1791_v39 = vpop.f32.mrf.mxu1 }
 0x2f7   : > { %v1628_v40 = vpop.f32.mrf.mxu0 }
 0x2f8   : > { %v2015_v7 = vmax.f32 %v1999_v38, 0.0  ;;  %v1648_v45 = vadd.f32 %v1623_v14, %v1481_v18 }
 0x2fa   : > { %2031 = vst.msk [vmem:[%s2470_s19 + $0x48] sm:$0xff] %vm463_vm2, %v2015_v7  ;;  %v1814_v48 = vadd.f32 %v1789_v23, %v1648_v45 }
 0x2fc   : > { %v1980_v58 = vadd.f32 %v1955_v25, %v1814_v48 }
 0x2fd   : > { %v1458_v54 = vpop.f32.mrf.mxu3 }
 0x2fe   : > { %v2000_v28 = vadd.f32 %v2870_v29, %v1980_v58  ;;  %v1482_v36 = vadd.f32 %v1458_v54, %v2844_v60  ;;  %v1957_v41 = vpop.f32.mrf.mxu2  ;;  %v1794_v8 = vpop.f32.mrf.mxu1 }
 0x2ff   : > { %v1630_v63 = vpop.f32.mrf.mxu0 }
 0x300   : > { %v2016_v49 = vmax.f32 %v2000_v28, 0.0  ;;  %v1649_v31 = vadd.f32 %v1625_v15, %v1482_v36 }
 0x302   : > { %2032 = vst.msk [vmem:[%s2470_s19 + $0x50] sm:$0xff] %vm463_vm2, %v2016_v49  ;;  %v1815_v35 = vadd.f32 %v1791_v39, %v1649_v31 }
 0x304   : > { %v1981_v56 = vadd.f32 %v1957_v41, %v1815_v35 }
 0x305   : > { %v1461_v59 = vpop.f32.mrf.mxu3 }
 0x306   : > { %v2001_v43 = vadd.f32 %v2870_v29, %v1981_v56  ;;  %v1483_v3 = vadd.f32 %v1461_v59, %v2852_v30  ;;  %v1960_v37 = vpop.f32.mrf.mxu2  ;;  %v1796_v55 = vpop.f32.mrf.mxu1 }
 0x307   : > { %v1633_v12 = vpop.f32.mrf.mxu0 }
 0x308   : > { %v2017_v50 = vmax.f32 %v2001_v43, 0.0  ;;  %v1650_v26 = vadd.f32 %v1628_v40, %v1483_v3 }
 0x30a   : > { %2033 = vst.msk [vmem:[%s2470_s19 + $0x58] sm:$0xff] %vm463_vm2, %v2017_v50  ;;  %v1816_v60 = vadd.f32 %v1794_v8, %v1650_v26 }
 0x30c   : > { %v1982_v1 = vadd.f32 %v1960_v37, %v1816_v60 }
 0x30d   : > { %v1463_v62 = vpop.f32.mrf.mxu3 }
 0x30e   : > { %v2002_v2 = vadd.f32 %v2870_v29, %v1982_v1  ;;  %v1484_v46 = vadd.f32 %v1463_v62, %v2855_v32  ;;  %v1962_v20 = vpop.f32.mrf.mxu2  ;;  %v1799_v0 = vpop.f32.mrf.mxu1 }
 0x30f   : > { %v1635_v53 = vpop.f32.mrf.mxu0 }
 0x310   : > { %v2018_v4 = vmax.f32 %v2002_v2, 0.0  ;;  %v1651_v27 = vadd.f32 %v1630_v63, %v1484_v46 }
 0x312   : > { %2034 = vst.msk [vmem:[%s2470_s19 + $0x60] sm:$0xff] %vm463_vm2, %v2018_v4  ;;  %v1817_v30 = vadd.f32 %v1796_v55, %v1651_v27 }
 0x314   : > { %v1983_v57 = vadd.f32 %v1962_v20, %v1817_v30 }
 0x315   : > { %v1466_v10 = vpop.f32.mrf.mxu3 }
 0x316   : > { %v2003_v42 = vadd.f32 %v2870_v29, %v1983_v57  ;;  %v1485_v13 = vadd.f32 %v1466_v10, %v2861_v6  ;;  %v1965_v5 = vpop.f32.mrf.mxu2  ;;  %v1801_v9 = vpop.f32.mrf.mxu1 }
 0x318   : > { %v2019_v47 = vmax.f32 %v2003_v42, 0.0  ;;  %v1652_v33 = vadd.f32 %v1633_v12, %v1485_v13 }
 0x31a   : > { %2035 = vst.msk [vmem:[%s2470_s19 + $0x68] sm:$0xff] %vm463_vm2, %v2019_v47  ;;  %v1818_v32 = vadd.f32 %v1799_v0, %v1652_v33 }
 0x31c   : > { %v1984_v16 = vadd.f32 %v1965_v5, %v1818_v32 }
 0x31d   : > { %v1468_v44 = vpop.f32.mrf.mxu3 }
 0x31e   : > { %v2004_v24 = vadd.f32 %v2870_v29, %v1984_v16  ;;  %v1486_v17 = vadd.f32 %v1468_v44, %v2864_v19  ;;  %v1967_v61 = vpop.f32.mrf.mxu2 }
 0x320   : > { %v2020_v14 = vmax.f32 %v2004_v24, 0.0  ;;  %v1653_v21 = vadd.f32 %v1635_v53, %v1486_v17 }
 0x322   : > { %2036 = vst.msk [vmem:[%s2470_s19 + $0x70] sm:$0xff] %vm463_vm2, %v2020_v14  ;;  %v1819_v6 = vadd.f32 %v1801_v9, %v1653_v21 }
 0x324   : > { %v1985_v23 = vadd.f32 %v1967_v61, %v1819_v6 }
 0x326   : > { %v2005_v11 = vadd.f32 %v2870_v29, %v1985_v23 }
 0x328   : > { %v2021_v52 = vmax.f32 %v2005_v11, 0.0 }
 0x32a   : > { %2037 = vst.msk [vmem:[%s2470_s19 + $0x78] sm:$0xff] %vm463_vm2, %v2021_v52 }
 0x32b PF: > { %s15_s22 = sadd.s32 1, %s2386_s22   ;;  %s2956_s18 = smov %s2378_s20 }
 0x32c   : > { %p12_p9 = scmp.ge.s32.totalorder %s15_s22, 6   ;;  %s2957_s19 = smov %s2382_s21 }
 0x32d   : > { %s2958_s20 = smov %s2961_s23  ;;  %s2959_s21 = smov %s2965_s24 }
 0x32e   :  { %14 = sbr.rel (!%p12_p9) target bundleno = 3 (0x3), region = 90 }

</bundles_post_ra>
